<compile_context>
chip_gen: v7x
topology: tpu7x:2x2x1
jax: 0.10.0
libtpu: 0.0.40
codegen_flags: <defaults>
</compile_context>

<pallas_src>
import functools
import math

import jax
import jax.numpy as jnp
from jax.experimental import pallas as pl

F32 = jnp.float32
BF16 = jnp.bfloat16


# ----------------------- in-kernel helpers (traced, VMEM-resident) -----------------------

def _matmul(x, w, b=None):
    """x (M,K) f32 -> bf16 @ w (K,N) bf16, f32 accumulate (+ f32 bias)."""
    y = jnp.dot(x.astype(BF16), w, preferred_element_type=F32)
    if b is not None:
        y = y + b
    return y


def _add_layernorm(x, r, g, b):
    """LayerNorm(x + r) in f32 — matches Residual: norm(tensors[0] + sublayer_out)."""
    y = x + r
    mean = jnp.mean(y, axis=-1, keepdims=True)
    var = jnp.mean(jnp.square(y - mean), axis=-1, keepdims=True)
    return (y - mean) * jax.lax.rsqrt(var + 1e-5) * g + b


def _softmax_lastdim(x, approx):
    m = jnp.max(x, axis=-1, keepdims=True)
    e = jnp.exp(x - m)
    return e * pl.reciprocal(jnp.sum(e, axis=-1, keepdims=True), approx=approx)


def _mha(q_in, k_in, v_in, wqkv, bqkv, wo, bo, *, B, Sq, Sk, H, dk):
    """Multi-head attention fully inside one kernel; inputs are 2-D (B*S, D) f32.

    QKV projection is a single fused matmul when q/k/v share the same input (self-attention);
    heads are processed with a statically-unrolled (batch, head) loop on lane slices so the
    dk=8 per-head tensors never leave VMEM.
    """
    D = H * dk
    if (q_in is k_in) and (k_in is v_in):
        qkv = _matmul(q_in, wqkv, bqkv)                       # (B*S, 3D) — one MXU pass
        q = qkv[:, 0 * D:1 * D]
        k = qkv[:, 1 * D:2 * D]
        v = qkv[:, 2 * D:3 * D]
    else:
        q = _matmul(q_in, wqkv[:, 0 * D:1 * D], bqkv[:, 0 * D:1 * D])
        k = _matmul(k_in, wqkv[:, 1 * D:2 * D], bqkv[:, 1 * D:2 * D])
        v = _matmul(v_in, wqkv[:, 2 * D:3 * D], bqkv[:, 2 * D:3 * D])

    inv_scale = 1.0 / math.sqrt(dk)
    batch_outs = []
    for b in range(B):                                        # static, unrolled
        qb = q[b * Sq:(b + 1) * Sq, :]
        kb = k[b * Sk:(b + 1) * Sk, :]
        vb = v[b * Sk:(b + 1) * Sk, :]
        heads = []
        for h in range(H):                                    # static, unrolled
            qh = qb[:, h * dk:(h + 1) * dk]
            kh = kb[:, h * dk:(h + 1) * dk]
            vh = vb[:, h * dk:(h + 1) * dk]
            s = jax.lax.dot_general(
                qh.astype(BF16), kh.astype(BF16),
                (((1,), (1,)), ((), ())),
                preferred_element_type=F32) * inv_scale       # (Sq, Sk) f32
            p = _softmax_lastdim(s, approx=True)              # f32 softmax
            heads.append(jnp.dot(p.astype(BF16), vh.astype(BF16),
                                 preferred_element_type=F32)) # (Sq, dk)
        batch_outs.append(jnp.concatenate(heads, axis=1))     # (Sq, D)
    o = jnp.concatenate(batch_outs, axis=0)                   # (B*Sq, D)
    return _matmul(o, wo, bo)


def _feed_forward(x, w1, b1, w2, b2):
    h = jnp.maximum(_matmul(x, w1, b1), 0.0)                  # hidden stays in VMEM
    return _matmul(h, w2, b2)


# --------------------------------- fused layer kernels -----------------------------------

def _encoder_layer_kernel(x_ref, wqkv_ref, bqkv_ref, wo_ref, bo_ref,
                          ln1g_ref, ln1b_ref,
                          w1_ref, b1_ref, w2_ref, b2_ref,
                          ln2g_ref, ln2b_ref,
                          o_ref, *, B, S, H, dk):
    x = x_ref[...]                                            # (B*S, D) f32
    a = _mha(x, x, x, wqkv_ref[...], bqkv_ref[...], wo_ref[...], bo_ref[...],
             B=B, Sq=S, Sk=S, H=H, dk=dk)
    x = _add_layernorm(x, a, ln1g_ref[...], ln1b_ref[...])
    ff = _feed_forward(x, w1_ref[...], b1_ref[...], w2_ref[...], b2_ref[...])
    o_ref[...] = _add_layernorm(x, ff, ln2g_ref[...], ln2b_ref[...])


def _decoder_layer_kernel(tgt_ref, enc_ref, mem_ref,
                          a1_wqkv_ref, a1_bqkv_ref, a1_wo_ref, a1_bo_ref,
                          ln1g_ref, ln1b_ref,
                          mw_ref, mb_ref,
                          a2_wqkv_ref, a2_bqkv_ref, a2_wo_ref, a2_bo_ref,
                          ln2g_ref, ln2b_ref,
                          w1_ref, b1_ref, w2_ref, b2_ref,
                          ln3g_ref, ln3b_ref,
                          o_ref, *, B, S, H, dk, M):
    tgt = tgt_ref[...]                                        # (B*S, D)
    enc = enc_ref[...]                                        # (B*S, D)

    # attention_1: self-attention on tgt; Residual adds tgt.
    a1 = _mha(tgt, tgt, tgt, a1_wqkv_ref[...], a1_bqkv_ref[...],
              a1_wo_ref[...], a1_bo_ref[...], B=B, Sq=S, Sk=S, H=H, dk=dk)
    d1 = _add_layernorm(tgt, a1, ln1g_ref[...], ln1b_ref[...])

    # MemoryAttention: linear(cat) -> alpha = softmax(mean over seq) -> weighted memory sum.
    # `combined` (B*S, M=5) and `alpha` (1, M) never leave VMEM (lane-sparse, per review).
    combined = _matmul(jnp.concatenate([enc, d1], axis=1), mw_ref[...], mb_ref[...])
    sm_rows = []
    for b in range(B):                                        # static, unrolled
        cb = combined[b * S:(b + 1) * S, :]                   # (S, M)
        alpha = _softmax_lastdim(jnp.mean(cb, axis=0, keepdims=True), approx=True)  # (1, M)
        acc = alpha[0:1, 0:1] * mem_ref[b, 0]                 # (S, D)
        for m in range(1, M):
            acc = acc + alpha[0:1, m:m + 1] * mem_ref[b, m]
        sm_rows.append(acc)
    sm = jnp.concatenate(sm_rows, axis=0)                     # (B*S, D)

    # attention_2: q=encoder_output, k=memory summary, v=d1; Residual adds encoder_output.
    a2 = _mha(enc, sm, d1, a2_wqkv_ref[...], a2_bqkv_ref[...],
              a2_wo_ref[...], a2_bo_ref[...], B=B, Sq=S, Sk=S, H=H, dk=dk)
    d2 = _add_layernorm(enc, a2, ln2g_ref[...], ln2b_ref[...])

    ff = _feed_forward(d2, w1_ref[...], b1_ref[...], w2_ref[...], b2_ref[...])
    o_ref[...] = _add_layernorm(d2, ff, ln3g_ref[...], ln3b_ref[...])


def _output_softmax_kernel(x_ref, w_ref, b_ref, o_ref):
    logits = _matmul(x_ref[...], w_ref[...], b_ref[...])      # (B*S, V) f32
    m = jnp.max(logits, axis=-1, keepdims=True)
    e = jnp.exp(logits - m)
    o_ref[...] = e / jnp.sum(e, axis=-1, keepdims=True)       # exact normalize (asserted)


# --------------------------------------- glue ---------------------------------------------

def encoder_layer(x, lp, cfg):
    T, D = x.shape
    a = lp["attn"]
    kernel = functools.partial(_encoder_layer_kernel, B=cfg["batch_size"],
                               S=cfg["max_len"], H=cfg["num_heads"],
                               dk=D // cfg["num_heads"])
    return pl.pallas_call(
        kernel, out_shape=jax.ShapeDtypeStruct((T, D), F32),
    )(x, a["wqkv"], a["bqkv"], a["wo"], a["bo"],
      lp["ln1_g"], lp["ln1_b"],
      lp["ff_w1"], lp["ff_b1"], lp["ff_w2"], lp["ff_b2"],
      lp["ln2_g"], lp["ln2_b"])


def decoder_layer(tgt, enc, short_memory, lp, cfg):
    T, D = tgt.shape
    a1, a2 = lp["attn1"], lp["attn2"]
    kernel = functools.partial(_decoder_layer_kernel, B=cfg["batch_size"],
                               S=cfg["max_len"], H=cfg["num_heads"],
                               dk=D // cfg["num_heads"], M=cfg["short_memory_size"])
    return pl.pallas_call(
        kernel, out_shape=jax.ShapeDtypeStruct((T, D), F32),
    )(tgt, enc, short_memory,
      a1["wqkv"], a1["bqkv"], a1["wo"], a1["bo"],
      lp["ln1_g"], lp["ln1_b"],
      lp["mem_w"], lp["mem_b"],
      a2["wqkv"], a2["bqkv"], a2["wo"], a2["bo"],
      lp["ln2_g"], lp["ln2_b"],
      lp["ff_w1"], lp["ff_b1"], lp["ff_w2"], lp["ff_b2"],
      lp["ln3_g"], lp["ln3_b"])


def output_softmax(x, w, b):
    T = x.shape[0]
    V = w.shape[1]
    return pl.pallas_call(
        _output_softmax_kernel, out_shape=jax.ShapeDtypeStruct((T, V), F32),
    )(x, w, b)


def position_encoding(seq_len, dim_model):
    pos = jnp.arange(seq_len, dtype=F32).reshape(1, -1, 1)
    dim = jnp.arange(dim_model, dtype=F32).reshape(1, 1, -1)
    phase = pos / (10000.0 ** (dim / dim_model))
    parity = (jnp.arange(dim_model).reshape(1, 1, -1) % 2) == 0
    return jnp.where(parity, jnp.sin(phase), jnp.cos(phase))


# ----------------------------------- parameters -------------------------------------------

def init_params(key, cfg):
    d = cfg["dim_model"]
    f = cfg["dim_feedforward"]
    v = cfg["vocab_size"]
    m = cfg["short_memory_size"]
    keys = iter(jax.random.split(key, 256))

    def lin(in_d, out_d):
        # Pre-transposed to (in, out) and pre-cast to bf16: kernels never transpose/convert weights.
        w = (jax.random.normal(next(keys), (in_d, out_d), F32) * 0.05).astype(BF16)
        b = jnp.zeros((1, out_d), F32)
        return w, b

    def mha_p():
        wqkv, bqkv = lin(d, 3 * d)          # fused Q|K|V projection
        wo, bo = lin(d, d)
        return dict(wqkv=wqkv, bqkv=bqkv, wo=wo, bo=bo)

    def ln_p():
        return jnp.ones((1, d), F32), jnp.zeros((1, d), F32)

    enc_layers = []
    for _ in range(cfg["num_encoder_layers"]):
        w1, b1 = lin(d, f)
        w2, b2 = lin(f, d)
        g1, be1 = ln_p()
        g2, be2 = ln_p()
        enc_layers.append(dict(attn=mha_p(), ln1_g=g1, ln1_b=be1,
                               ff_w1=w1, ff_b1=b1, ff_w2=w2, ff_b2=b2,
                               ln2_g=g2, ln2_b=be2))

    dec_layers = []
    for _ in range(cfg["num_decoder_layers"]):
        w1, b1 = lin(d, f)
        w2, b2 = lin(f, d)
        wm, bm = lin(2 * d, m)
        g1, be1 = ln_p()
        g2, be2 = ln_p()
        g3, be3 = ln_p()
        dec_layers.append(dict(attn1=mha_p(), attn2=mha_p(),
                               mem_w=wm, mem_b=bm,
                               ln1_g=g1, ln1_b=be1, ln2_g=g2, ln2_b=be2,
                               ff_w1=w1, ff_b1=b1, ff_w2=w2, ff_b2=b2,
                               ln3_g=g3, ln3_b=be3))

    emb = jax.random.normal(next(keys), (v, d), F32) * 0.05
    out_w, out_b = lin(d, v)
    return dict(embedding=emb, encoder_layers=enc_layers, decoder_layers=dec_layers,
                out_w=out_w, out_b=out_b)


# ------------------------------------- forward --------------------------------------------

def transformer_short_memory_forward(params, src_tok, tgt_tok, memory_buf, memory_index, cfg):
    d = cfg["dim_model"]
    m = cfg["short_memory_size"]
    B, S = src_tok.shape
    emb = params["embedding"]

    src = (emb[src_tok] + position_encoding(S, d)).reshape(B * S, d)
    tgt = (emb[tgt_tok] + position_encoding(tgt_tok.shape[1], d)).reshape(B * tgt_tok.shape[1], d)

    # --- encoder: one fused pallas_call per layer ---
    x = src
    for lp in params["encoder_layers"]:
        x = encoder_layer(x, lp, cfg)
    encoder_output = x                                         # (B*S, D)

    # --- ShortMemory.update_memory + extract_memory (ring buffer along the memory axis) ---
    # TODO(synk): at scale, do this write inside a pallas_call with input_output_aliases (P8)
    #             to update the buffer in place instead of an XLA full-buffer copy.
    memory_buf = memory_buf.at[:, memory_index].set(encoder_output.reshape(B, S, d))
    new_index = (memory_index + 1) % m
    idx = (jnp.arange(m) + new_index - (m - 1)) % m            # range(new_index-(M-1), new_index+1) mod M
    short_memory = memory_buf[:, idx]                          # (B, M, S, D)

    # --- decoder: one fused pallas_call per layer ---
    dec = tgt
    for lp in params["decoder_layers"]:
        dec = decoder_layer(dec, encoder_output, short_memory, lp, cfg)

    # --- final projection + softmax, fused ---
    probs = output_softmax(dec, params["out_w"], params["out_b"])
    return probs.reshape(B, S, cfg["vocab_size"]), memory_buf, new_index


# --------------------------------------- main ----------------------------------------------

if __name__ == "__main__":
    cfg = dict(num_encoder_layers=2, num_decoder_layers=2, dim_model=32, num_heads=4,
               dim_feedforward=64, dropout=0.0, short_memory_size=5, vocab_size=64,
               batch_size=2, max_len=8)

    key = jax.random.PRNGKey(0)
    pkey, skey, tkey = jax.random.split(key, 3)
    params = init_params(pkey, cfg)

    B, S = cfg["batch_size"], cfg["max_len"]
    V, M, D = cfg["vocab_size"], cfg["short_memory_size"], cfg["dim_model"]

    src = jax.random.randint(skey, (B, S), 0, V)
    tgt = jax.random.randint(tkey, (B, S), 0, V)

    # initialize_memory()
    memory_buf = jnp.zeros((B, M, S, D), F32)
    memory_index = 0

    out, memory_buf, memory_index = transformer_short_memory_forward(
        params, src, tgt, memory_buf, memory_index, cfg)
    out = jax.block_until_ready(out)

    assert out.shape == (B, S, V), out.shape
    assert bool(jnp.all(jnp.isfinite(out)))
    assert bool(jnp.allclose(jnp.sum(out, axis=-1), 1.0, atol=1e-3))
    print("KERNEL_OK")
</pallas_src>

<mosaic_0001>
module attributes {stable_mosaic.version = 11 : i64} {
  func.func @_encoder_layer_kernel(%arg0: memref<16x32xf32, #tpu.memory_space<vmem>>, %arg1: memref<32x96xbf16, #tpu.memory_space<vmem>>, %arg2: memref<1x96xf32, #tpu.memory_space<vmem>>, %arg3: memref<32x32xbf16, #tpu.memory_space<vmem>>, %arg4: memref<1x32xf32, #tpu.memory_space<vmem>>, %arg5: memref<1x32xf32, #tpu.memory_space<vmem>>, %arg6: memref<1x32xf32, #tpu.memory_space<vmem>>, %arg7: memref<32x64xbf16, #tpu.memory_space<vmem>>, %arg8: memref<1x64xf32, #tpu.memory_space<vmem>>, %arg9: memref<64x32xbf16, #tpu.memory_space<vmem>>, %arg10: memref<1x32xf32, #tpu.memory_space<vmem>>, %arg11: memref<1x32xf32, #tpu.memory_space<vmem>>, %arg12: memref<1x32xf32, #tpu.memory_space<vmem>>, %arg13: memref<16x32xf32, #tpu.memory_space<vmem>>) attributes {dimension_semantics = [], scalar_prefetch = 0 : i64, scratch_operands = 0 : i64, tpu.core_type = #tpu.core_type<tc>} {
    %c0 = arith.constant 0 : index
    %c0_0 = arith.constant 0 : index
    %0 = vector.load %arg0[%c0, %c0_0] : memref<16x32xf32, #tpu.memory_space<vmem>>, vector<16x32xf32>
    %c0_1 = arith.constant 0 : index
    %c0_2 = arith.constant 0 : index
    %1 = vector.load %arg1[%c0_1, %c0_2] : memref<32x96xbf16, #tpu.memory_space<vmem>>, vector<32x96xbf16>
    %c0_3 = arith.constant 0 : index
    %c0_4 = arith.constant 0 : index
    %2 = vector.load %arg2[%c0_3, %c0_4] : memref<1x96xf32, #tpu.memory_space<vmem>>, vector<1x96xf32>
    %c0_5 = arith.constant 0 : index
    %c0_6 = arith.constant 0 : index
    %3 = vector.load %arg3[%c0_5, %c0_6] : memref<32x32xbf16, #tpu.memory_space<vmem>>, vector<32x32xbf16>
    %c0_7 = arith.constant 0 : index
    %c0_8 = arith.constant 0 : index
    %4 = vector.load %arg4[%c0_7, %c0_8] : memref<1x32xf32, #tpu.memory_space<vmem>>, vector<1x32xf32>
    %5 = arith.truncf %0 : vector<16x32xf32> to vector<16x32xbf16>
    %cst = arith.constant dense<0.000000e+00> : vector<16x96xf32>
    %6 = tpu.matmul %5, %1, %cst {dimension_numbers = #tpu.dot_dimension_numbers<[1], [0], [0], [1], [0, 0, 1, 1], [], []>} : vector<16x32xbf16>, vector<32x96xbf16>, vector<16x96xf32> -> vector<16x96xf32>
    %7 = vector.broadcast %2 : vector<1x96xf32> to vector<16x96xf32>
    %8 = arith.addf %6, %7 : vector<16x96xf32>
    %9 = vector.extract_strided_slice %8 {offsets = [0, 0], sizes = [16, 32], strides = [1, 1]} : vector<16x96xf32> to vector<16x32xf32>
    %10 = vector.extract_strided_slice %8 {offsets = [0, 32], sizes = [16, 32], strides = [1, 1]} : vector<16x96xf32> to vector<16x32xf32>
    %11 = vector.extract_strided_slice %8 {offsets = [0, 64], sizes = [16, 32], strides = [1, 1]} : vector<16x96xf32> to vector<16x32xf32>
    %12 = vector.extract_strided_slice %9 {offsets = [0, 0], sizes = [8, 32], strides = [1, 1]} : vector<16x32xf32> to vector<8x32xf32>
    %13 = vector.extract_strided_slice %10 {offsets = [0, 0], sizes = [8, 32], strides = [1, 1]} : vector<16x32xf32> to vector<8x32xf32>
    %14 = vector.extract_strided_slice %11 {offsets = [0, 0], sizes = [8, 32], strides = [1, 1]} : vector<16x32xf32> to vector<8x32xf32>
    %15 = vector.extract_strided_slice %12 {offsets = [0, 0], sizes = [8, 8], strides = [1, 1]} : vector<8x32xf32> to vector<8x8xf32>
    %16 = vector.extract_strided_slice %13 {offsets = [0, 0], sizes = [8, 8], strides = [1, 1]} : vector<8x32xf32> to vector<8x8xf32>
    %17 = vector.extract_strided_slice %14 {offsets = [0, 0], sizes = [8, 8], strides = [1, 1]} : vector<8x32xf32> to vector<8x8xf32>
    %18 = arith.truncf %15 : vector<8x8xf32> to vector<8x8xbf16>
    %19 = arith.truncf %16 : vector<8x8xf32> to vector<8x8xbf16>
    %cst_9 = arith.constant dense<0.000000e+00> : vector<8x8xf32>
    %20 = tpu.matmul %18, %19, %cst_9 {dimension_numbers = #tpu.dot_dimension_numbers<[1], [1], [0], [0], [0, 0, 1, 0], [], []>} : vector<8x8xbf16>, vector<8x8xbf16>, vector<8x8xf32> -> vector<8x8xf32>
    %cst_10 = arith.constant 0.353553385 : f32
    %21 = vector.broadcast %cst_10 : f32 to vector<8x8xf32>
    %22 = arith.mulf %20, %21 : vector<8x8xf32>
    %cst_11 = arith.constant dense<0xFF800000> : vector<8xf32>
    %23 = vector.multi_reduction <maximumf>, %22, %cst_11 [1] : vector<8x8xf32> to vector<8xf32>
    %24 = vector.shape_cast %23 : vector<8xf32> to vector<8x1xf32>
    %25 = vector.broadcast %24 : vector<8x1xf32> to vector<8x8xf32>
    %26 = arith.subf %22, %25 : vector<8x8xf32>
    %27 = math.exp %26 : vector<8x8xf32>
    %cst_12 = arith.constant dense<0.000000e+00> : vector<8xf32>
    %28 = vector.multi_reduction <add>, %27, %cst_12 [1] : vector<8x8xf32> to vector<8xf32>
    %29 = vector.shape_cast %28 : vector<8xf32> to vector<8x1xf32>
    %30 = tpu.reciprocal %29 {approx = true} : vector<8x1xf32> -> vector<8x1xf32>
    %31 = vector.broadcast %30 : vector<8x1xf32> to vector<8x8xf32>
    %32 = arith.mulf %27, %31 : vector<8x8xf32>
    %33 = arith.truncf %32 : vector<8x8xf32> to vector<8x8xbf16>
    %34 = arith.truncf %17 : vector<8x8xf32> to vector<8x8xbf16>
    %cst_13 = arith.constant dense<0.000000e+00> : vector<8x8xf32>
    %35 = tpu.matmul %33, %34, %cst_13 {dimension_numbers = #tpu.dot_dimension_numbers<[1], [0], [0], [1], [0, 0, 1, 1], [], []>} : vector<8x8xbf16>, vector<8x8xbf16>, vector<8x8xf32> -> vector<8x8xf32>
    %36 = vector.extract_strided_slice %12 {offsets = [0, 8], sizes = [8, 8], strides = [1, 1]} : vector<8x32xf32> to vector<8x8xf32>
    %37 = vector.extract_strided_slice %13 {offsets = [0, 8], sizes = [8, 8], strides = [1, 1]} : vector<8x32xf32> to vector<8x8xf32>
    %38 = vector.extract_strided_slice %14 {offsets = [0, 8], sizes = [8, 8], strides = [1, 1]} : vector<8x32xf32> to vector<8x8xf32>
    %39 = arith.truncf %36 : vector<8x8xf32> to vector<8x8xbf16>
    %40 = arith.truncf %37 : vector<8x8xf32> to vector<8x8xbf16>
    %cst_14 = arith.constant dense<0.000000e+00> : vector<8x8xf32>
    %41 = tpu.matmul %39, %40, %cst_14 {dimension_numbers = #tpu.dot_dimension_numbers<[1], [1], [0], [0], [0, 0, 1, 0], [], []>} : vector<8x8xbf16>, vector<8x8xbf16>, vector<8x8xf32> -> vector<8x8xf32>
    %cst_15 = arith.constant 0.353553385 : f32
    %42 = vector.broadcast %cst_15 : f32 to vector<8x8xf32>
    %43 = arith.mulf %41, %42 : vector<8x8xf32>
    %cst_16 = arith.constant dense<0xFF800000> : vector<8xf32>
    %44 = vector.multi_reduction <maximumf>, %43, %cst_16 [1] : vector<8x8xf32> to vector<8xf32>
    %45 = vector.shape_cast %44 : vector<8xf32> to vector<8x1xf32>
    %46 = vector.broadcast %45 : vector<8x1xf32> to vector<8x8xf32>
    %47 = arith.subf %43, %46 : vector<8x8xf32>
    %48 = math.exp %47 : vector<8x8xf32>
    %cst_17 = arith.constant dense<0.000000e+00> : vector<8xf32>
    %49 = vector.multi_reduction <add>, %48, %cst_17 [1] : vector<8x8xf32> to vector<8xf32>
    %50 = vector.shape_cast %49 : vector<8xf32> to vector<8x1xf32>
    %51 = tpu.reciprocal %50 {approx = true} : vector<8x1xf32> -> vector<8x1xf32>
    %52 = vector.broadcast %51 : vector<8x1xf32> to vector<8x8xf32>
    %53 = arith.mulf %48, %52 : vector<8x8xf32>
    %54 = arith.truncf %53 : vector<8x8xf32> to vector<8x8xbf16>
    %55 = arith.truncf %38 : vector<8x8xf32> to vector<8x8xbf16>
    %cst_18 = arith.constant dense<0.000000e+00> : vector<8x8xf32>
    %56 = tpu.matmul %54, %55, %cst_18 {dimension_numbers = #tpu.dot_dimension_numbers<[1], [0], [0], [1], [0, 0, 1, 1], [], []>} : vector<8x8xbf16>, vector<8x8xbf16>, vector<8x8xf32> -> vector<8x8xf32>
    %57 = vector.extract_strided_slice %12 {offsets = [0, 16], sizes = [8, 8], strides = [1, 1]} : vector<8x32xf32> to vector<8x8xf32>
    %58 = vector.extract_strided_slice %13 {offsets = [0, 16], sizes = [8, 8], strides = [1, 1]} : vector<8x32xf32> to vector<8x8xf32>
    %59 = vector.extract_strided_slice %14 {offsets = [0, 16], sizes = [8, 8], strides = [1, 1]} : vector<8x32xf32> to vector<8x8xf32>
    %60 = arith.truncf %57 : vector<8x8xf32> to vector<8x8xbf16>
    %61 = arith.truncf %58 : vector<8x8xf32> to vector<8x8xbf16>
    %cst_19 = arith.constant dense<0.000000e+00> : vector<8x8xf32>
    %62 = tpu.matmul %60, %61, %cst_19 {dimension_numbers = #tpu.dot_dimension_numbers<[1], [1], [0], [0], [0, 0, 1, 0], [], []>} : vector<8x8xbf16>, vector<8x8xbf16>, vector<8x8xf32> -> vector<8x8xf32>
    %cst_20 = arith.constant 0.353553385 : f32
    %63 = vector.broadcast %cst_20 : f32 to vector<8x8xf32>
    %64 = arith.mulf %62, %63 : vector<8x8xf32>
    %cst_21 = arith.constant dense<0xFF800000> : vector<8xf32>
    %65 = vector.multi_reduction <maximumf>, %64, %cst_21 [1] : vector<8x8xf32> to vector<8xf32>
    %66 = vector.shape_cast %65 : vector<8xf32> to vector<8x1xf32>
    %67 = vector.broadcast %66 : vector<8x1xf32> to vector<8x8xf32>
    %68 = arith.subf %64, %67 : vector<8x8xf32>
    %69 = math.exp %68 : vector<8x8xf32>
    %cst_22 = arith.constant dense<0.000000e+00> : vector<8xf32>
    %70 = vector.multi_reduction <add>, %69, %cst_22 [1] : vector<8x8xf32> to vector<8xf32>
    %71 = vector.shape_cast %70 : vector<8xf32> to vector<8x1xf32>
    %72 = tpu.reciprocal %71 {approx = true} : vector<8x1xf32> -> vector<8x1xf32>
    %73 = vector.broadcast %72 : vector<8x1xf32> to vector<8x8xf32>
    %74 = arith.mulf %69, %73 : vector<8x8xf32>
    %75 = arith.truncf %74 : vector<8x8xf32> to vector<8x8xbf16>
    %76 = arith.truncf %59 : vector<8x8xf32> to vector<8x8xbf16>
    %cst_23 = arith.constant dense<0.000000e+00> : vector<8x8xf32>
    %77 = tpu.matmul %75, %76, %cst_23 {dimension_numbers = #tpu.dot_dimension_numbers<[1], [0], [0], [1], [0, 0, 1, 1], [], []>} : vector<8x8xbf16>, vector<8x8xbf16>, vector<8x8xf32> -> vector<8x8xf32>
    %78 = vector.extract_strided_slice %12 {offsets = [0, 24], sizes = [8, 8], strides = [1, 1]} : vector<8x32xf32> to vector<8x8xf32>
    %79 = vector.extract_strided_slice %13 {offsets = [0, 24], sizes = [8, 8], strides = [1, 1]} : vector<8x32xf32> to vector<8x8xf32>
    %80 = vector.extract_strided_slice %14 {offsets = [0, 24], sizes = [8, 8], strides = [1, 1]} : vector<8x32xf32> to vector<8x8xf32>
    %81 = arith.truncf %78 : vector<8x8xf32> to vector<8x8xbf16>
    %82 = arith.truncf %79 : vector<8x8xf32> to vector<8x8xbf16>
    %cst_24 = arith.constant dense<0.000000e+00> : vector<8x8xf32>
    %83 = tpu.matmul %81, %82, %cst_24 {dimension_numbers = #tpu.dot_dimension_numbers<[1], [1], [0], [0], [0, 0, 1, 0], [], []>} : vector<8x8xbf16>, vector<8x8xbf16>, vector<8x8xf32> -> vector<8x8xf32>
    %cst_25 = arith.constant 0.353553385 : f32
    %84 = vector.broadcast %cst_25 : f32 to vector<8x8xf32>
    %85 = arith.mulf %83, %84 : vector<8x8xf32>
    %cst_26 = arith.constant dense<0xFF800000> : vector<8xf32>
    %86 = vector.multi_reduction <maximumf>, %85, %cst_26 [1] : vector<8x8xf32> to vector<8xf32>
    %87 = vector.shape_cast %86 : vector<8xf32> to vector<8x1xf32>
    %88 = vector.broadcast %87 : vector<8x1xf32> to vector<8x8xf32>
    %89 = arith.subf %85, %88 : vector<8x8xf32>
    %90 = math.exp %89 : vector<8x8xf32>
    %cst_27 = arith.constant dense<0.000000e+00> : vector<8xf32>
    %91 = vector.multi_reduction <add>, %90, %cst_27 [1] : vector<8x8xf32> to vector<8xf32>
    %92 = vector.shape_cast %91 : vector<8xf32> to vector<8x1xf32>
    %93 = tpu.reciprocal %92 {approx = true} : vector<8x1xf32> -> vector<8x1xf32>
    %94 = vector.broadcast %93 : vector<8x1xf32> to vector<8x8xf32>
    %95 = arith.mulf %90, %94 : vector<8x8xf32>
    %96 = arith.truncf %95 : vector<8x8xf32> to vector<8x8xbf16>
    %97 = arith.truncf %80 : vector<8x8xf32> to vector<8x8xbf16>
    %cst_28 = arith.constant dense<0.000000e+00> : vector<8x8xf32>
    %98 = tpu.matmul %96, %97, %cst_28 {dimension_numbers = #tpu.dot_dimension_numbers<[1], [0], [0], [1], [0, 0, 1, 1], [], []>} : vector<8x8xbf16>, vector<8x8xbf16>, vector<8x8xf32> -> vector<8x8xf32>
    %99 = tpu.concatenate %35, %56, %77, %98 in 1 : vector<8x8xf32>, vector<8x8xf32>, vector<8x8xf32>, vector<8x8xf32> -> vector<8x32xf32>
    %100 = vector.extract_strided_slice %9 {offsets = [8, 0], sizes = [8, 32], strides = [1, 1]} : vector<16x32xf32> to vector<8x32xf32>
    %101 = vector.extract_strided_slice %10 {offsets = [8, 0], sizes = [8, 32], strides = [1, 1]} : vector<16x32xf32> to vector<8x32xf32>
    %102 = vector.extract_strided_slice %11 {offsets = [8, 0], sizes = [8, 32], strides = [1, 1]} : vector<16x32xf32> to vector<8x32xf32>
    %103 = vector.extract_strided_slice %100 {offsets = [0, 0], sizes = [8, 8], strides = [1, 1]} : vector<8x32xf32> to vector<8x8xf32>
    %104 = vector.extract_strided_slice %101 {offsets = [0, 0], sizes = [8, 8], strides = [1, 1]} : vector<8x32xf32> to vector<8x8xf32>
    %105 = vector.extract_strided_slice %102 {offsets = [0, 0], sizes = [8, 8], strides = [1, 1]} : vector<8x32xf32> to vector<8x8xf32>
    %106 = arith.truncf %103 : vector<8x8xf32> to vector<8x8xbf16>
    %107 = arith.truncf %104 : vector<8x8xf32> to vector<8x8xbf16>
    %cst_29 = arith.constant dense<0.000000e+00> : vector<8x8xf32>
    %108 = tpu.matmul %106, %107, %cst_29 {dimension_numbers = #tpu.dot_dimension_numbers<[1], [1], [0], [0], [0, 0, 1, 0], [], []>} : vector<8x8xbf16>, vector<8x8xbf16>, vector<8x8xf32> -> vector<8x8xf32>
    %cst_30 = arith.constant 0.353553385 : f32
    %109 = vector.broadcast %cst_30 : f32 to vector<8x8xf32>
    %110 = arith.mulf %108, %109 : vector<8x8xf32>
    %cst_31 = arith.constant dense<0xFF800000> : vector<8xf32>
    %111 = vector.multi_reduction <maximumf>, %110, %cst_31 [1] : vector<8x8xf32> to vector<8xf32>
    %112 = vector.shape_cast %111 : vector<8xf32> to vector<8x1xf32>
    %113 = vector.broadcast %112 : vector<8x1xf32> to vector<8x8xf32>
    %114 = arith.subf %110, %113 : vector<8x8xf32>
    %115 = math.exp %114 : vector<8x8xf32>
    %cst_32 = arith.constant dense<0.000000e+00> : vector<8xf32>
    %116 = vector.multi_reduction <add>, %115, %cst_32 [1] : vector<8x8xf32> to vector<8xf32>
    %117 = vector.shape_cast %116 : vector<8xf32> to vector<8x1xf32>
    %118 = tpu.reciprocal %117 {approx = true} : vector<8x1xf32> -> vector<8x1xf32>
    %119 = vector.broadcast %118 : vector<8x1xf32> to vector<8x8xf32>
    %120 = arith.mulf %115, %119 : vector<8x8xf32>
    %121 = arith.truncf %120 : vector<8x8xf32> to vector<8x8xbf16>
    %122 = arith.truncf %105 : vector<8x8xf32> to vector<8x8xbf16>
    %cst_33 = arith.constant dense<0.000000e+00> : vector<8x8xf32>
    %123 = tpu.matmul %121, %122, %cst_33 {dimension_numbers = #tpu.dot_dimension_numbers<[1], [0], [0], [1], [0, 0, 1, 1], [], []>} : vector<8x8xbf16>, vector<8x8xbf16>, vector<8x8xf32> -> vector<8x8xf32>
    %124 = vector.extract_strided_slice %100 {offsets = [0, 8], sizes = [8, 8], strides = [1, 1]} : vector<8x32xf32> to vector<8x8xf32>
    %125 = vector.extract_strided_slice %101 {offsets = [0, 8], sizes = [8, 8], strides = [1, 1]} : vector<8x32xf32> to vector<8x8xf32>
    %126 = vector.extract_strided_slice %102 {offsets = [0, 8], sizes = [8, 8], strides = [1, 1]} : vector<8x32xf32> to vector<8x8xf32>
    %127 = arith.truncf %124 : vector<8x8xf32> to vector<8x8xbf16>
    %128 = arith.truncf %125 : vector<8x8xf32> to vector<8x8xbf16>
    %cst_34 = arith.constant dense<0.000000e+00> : vector<8x8xf32>
    %129 = tpu.matmul %127, %128, %cst_34 {dimension_numbers = #tpu.dot_dimension_numbers<[1], [1], [0], [0], [0, 0, 1, 0], [], []>} : vector<8x8xbf16>, vector<8x8xbf16>, vector<8x8xf32> -> vector<8x8xf32>
    %cst_35 = arith.constant 0.353553385 : f32
    %130 = vector.broadcast %cst_35 : f32 to vector<8x8xf32>
    %131 = arith.mulf %129, %130 : vector<8x8xf32>
    %cst_36 = arith.constant dense<0xFF800000> : vector<8xf32>
    %132 = vector.multi_reduction <maximumf>, %131, %cst_36 [1] : vector<8x8xf32> to vector<8xf32>
    %133 = vector.shape_cast %132 : vector<8xf32> to vector<8x1xf32>
    %134 = vector.broadcast %133 : vector<8x1xf32> to vector<8x8xf32>
    %135 = arith.subf %131, %134 : vector<8x8xf32>
    %136 = math.exp %135 : vector<8x8xf32>
    %cst_37 = arith.constant dense<0.000000e+00> : vector<8xf32>
    %137 = vector.multi_reduction <add>, %136, %cst_37 [1] : vector<8x8xf32> to vector<8xf32>
    %138 = vector.shape_cast %137 : vector<8xf32> to vector<8x1xf32>
    %139 = tpu.reciprocal %138 {approx = true} : vector<8x1xf32> -> vector<8x1xf32>
    %140 = vector.broadcast %139 : vector<8x1xf32> to vector<8x8xf32>
    %141 = arith.mulf %136, %140 : vector<8x8xf32>
    %142 = arith.truncf %141 : vector<8x8xf32> to vector<8x8xbf16>
    %143 = arith.truncf %126 : vector<8x8xf32> to vector<8x8xbf16>
    %cst_38 = arith.constant dense<0.000000e+00> : vector<8x8xf32>
    %144 = tpu.matmul %142, %143, %cst_38 {dimension_numbers = #tpu.dot_dimension_numbers<[1], [0], [0], [1], [0, 0, 1, 1], [], []>} : vector<8x8xbf16>, vector<8x8xbf16>, vector<8x8xf32> -> vector<8x8xf32>
    %145 = vector.extract_strided_slice %100 {offsets = [0, 16], sizes = [8, 8], strides = [1, 1]} : vector<8x32xf32> to vector<8x8xf32>
    %146 = vector.extract_strided_slice %101 {offsets = [0, 16], sizes = [8, 8], strides = [1, 1]} : vector<8x32xf32> to vector<8x8xf32>
    %147 = vector.extract_strided_slice %102 {offsets = [0, 16], sizes = [8, 8], strides = [1, 1]} : vector<8x32xf32> to vector<8x8xf32>
    %148 = arith.truncf %145 : vector<8x8xf32> to vector<8x8xbf16>
    %149 = arith.truncf %146 : vector<8x8xf32> to vector<8x8xbf16>
    %cst_39 = arith.constant dense<0.000000e+00> : vector<8x8xf32>
    %150 = tpu.matmul %148, %149, %cst_39 {dimension_numbers = #tpu.dot_dimension_numbers<[1], [1], [0], [0], [0, 0, 1, 0], [], []>} : vector<8x8xbf16>, vector<8x8xbf16>, vector<8x8xf32> -> vector<8x8xf32>
    %cst_40 = arith.constant 0.353553385 : f32
    %151 = vector.broadcast %cst_40 : f32 to vector<8x8xf32>
    %152 = arith.mulf %150, %151 : vector<8x8xf32>
    %cst_41 = arith.constant dense<0xFF800000> : vector<8xf32>
    %153 = vector.multi_reduction <maximumf>, %152, %cst_41 [1] : vector<8x8xf32> to vector<8xf32>
    %154 = vector.shape_cast %153 : vector<8xf32> to vector<8x1xf32>
    %155 = vector.broadcast %154 : vector<8x1xf32> to vector<8x8xf32>
    %156 = arith.subf %152, %155 : vector<8x8xf32>
    %157 = math.exp %156 : vector<8x8xf32>
    %cst_42 = arith.constant dense<0.000000e+00> : vector<8xf32>
    %158 = vector.multi_reduction <add>, %157, %cst_42 [1] : vector<8x8xf32> to vector<8xf32>
    %159 = vector.shape_cast %158 : vector<8xf32> to vector<8x1xf32>
    %160 = tpu.reciprocal %159 {approx = true} : vector<8x1xf32> -> vector<8x1xf32>
    %161 = vector.broadcast %160 : vector<8x1xf32> to vector<8x8xf32>
    %162 = arith.mulf %157, %161 : vector<8x8xf32>
    %163 = arith.truncf %162 : vector<8x8xf32> to vector<8x8xbf16>
    %164 = arith.truncf %147 : vector<8x8xf32> to vector<8x8xbf16>
    %cst_43 = arith.constant dense<0.000000e+00> : vector<8x8xf32>
    %165 = tpu.matmul %163, %164, %cst_43 {dimension_numbers = #tpu.dot_dimension_numbers<[1], [0], [0], [1], [0, 0, 1, 1], [], []>} : vector<8x8xbf16>, vector<8x8xbf16>, vector<8x8xf32> -> vector<8x8xf32>
    %166 = vector.extract_strided_slice %100 {offsets = [0, 24], sizes = [8, 8], strides = [1, 1]} : vector<8x32xf32> to vector<8x8xf32>
    %167 = vector.extract_strided_slice %101 {offsets = [0, 24], sizes = [8, 8], strides = [1, 1]} : vector<8x32xf32> to vector<8x8xf32>
    %168 = vector.extract_strided_slice %102 {offsets = [0, 24], sizes = [8, 8], strides = [1, 1]} : vector<8x32xf32> to vector<8x8xf32>
    %169 = arith.truncf %166 : vector<8x8xf32> to vector<8x8xbf16>
    %170 = arith.truncf %167 : vector<8x8xf32> to vector<8x8xbf16>
    %cst_44 = arith.constant dense<0.000000e+00> : vector<8x8xf32>
    %171 = tpu.matmul %169, %170, %cst_44 {dimension_numbers = #tpu.dot_dimension_numbers<[1], [1], [0], [0], [0, 0, 1, 0], [], []>} : vector<8x8xbf16>, vector<8x8xbf16>, vector<8x8xf32> -> vector<8x8xf32>
    %cst_45 = arith.constant 0.353553385 : f32
    %172 = vector.broadcast %cst_45 : f32 to vector<8x8xf32>
    %173 = arith.mulf %171, %172 : vector<8x8xf32>
    %cst_46 = arith.constant dense<0xFF800000> : vector<8xf32>
    %174 = vector.multi_reduction <maximumf>, %173, %cst_46 [1] : vector<8x8xf32> to vector<8xf32>
    %175 = vector.shape_cast %174 : vector<8xf32> to vector<8x1xf32>
    %176 = vector.broadcast %175 : vector<8x1xf32> to vector<8x8xf32>
    %177 = arith.subf %173, %176 : vector<8x8xf32>
    %178 = math.exp %177 : vector<8x8xf32>
    %cst_47 = arith.constant dense<0.000000e+00> : vector<8xf32>
    %179 = vector.multi_reduction <add>, %178, %cst_47 [1] : vector<8x8xf32> to vector<8xf32>
    %180 = vector.shape_cast %179 : vector<8xf32> to vector<8x1xf32>
    %181 = tpu.reciprocal %180 {approx = true} : vector<8x1xf32> -> vector<8x1xf32>
    %182 = vector.broadcast %181 : vector<8x1xf32> to vector<8x8xf32>
    %183 = arith.mulf %178, %182 : vector<8x8xf32>
    %184 = arith.truncf %183 : vector<8x8xf32> to vector<8x8xbf16>
    %185 = arith.truncf %168 : vector<8x8xf32> to vector<8x8xbf16>
    %cst_48 = arith.constant dense<0.000000e+00> : vector<8x8xf32>
    %186 = tpu.matmul %184, %185, %cst_48 {dimension_numbers = #tpu.dot_dimension_numbers<[1], [0], [0], [1], [0, 0, 1, 1], [], []>} : vector<8x8xbf16>, vector<8x8xbf16>, vector<8x8xf32> -> vector<8x8xf32>
    %187 = tpu.concatenate %123, %144, %165, %186 in 1 : vector<8x8xf32>, vector<8x8xf32>, vector<8x8xf32>, vector<8x8xf32> -> vector<8x32xf32>
    %188 = tpu.concatenate %99, %187 in 0 : vector<8x32xf32>, vector<8x32xf32> -> vector<16x32xf32>
    %189 = arith.truncf %188 : vector<16x32xf32> to vector<16x32xbf16>
    %cst_49 = arith.constant dense<0.000000e+00> : vector<16x32xf32>
    %190 = tpu.matmul %189, %3, %cst_49 {dimension_numbers = #tpu.dot_dimension_numbers<[1], [0], [0], [1], [0, 0, 1, 1], [], []>} : vector<16x32xbf16>, vector<32x32xbf16>, vector<16x32xf32> -> vector<16x32xf32>
    %191 = vector.broadcast %4 : vector<1x32xf32> to vector<16x32xf32>
    %192 = arith.addf %190, %191 : vector<16x32xf32>
    %c0_50 = arith.constant 0 : index
    %c0_51 = arith.constant 0 : index
    %193 = vector.load %arg5[%c0_50, %c0_51] : memref<1x32xf32, #tpu.memory_space<vmem>>, vector<1x32xf32>
    %c0_52 = arith.constant 0 : index
    %c0_53 = arith.constant 0 : index
    %194 = vector.load %arg6[%c0_52, %c0_53] : memref<1x32xf32, #tpu.memory_space<vmem>>, vector<1x32xf32>
    %195 = arith.addf %0, %192 : vector<16x32xf32>
    %cst_54 = arith.constant dense<0.000000e+00> : vector<16xf32>
    %196 = vector.multi_reduction <add>, %195, %cst_54 [1] : vector<16x32xf32> to vector<16xf32>
    %197 = vector.shape_cast %196 : vector<16xf32> to vector<16x1xf32>
    %cst_55 = arith.constant 3.200000e+01 : f32
    %198 = vector.broadcast %cst_55 : f32 to vector<16x1xf32>
    %199 = arith.divf %197, %198 : vector<16x1xf32>
    %200 = vector.broadcast %199 : vector<16x1xf32> to vector<16x32xf32>
    %201 = arith.subf %195, %200 : vector<16x32xf32>
    %202 = arith.mulf %201, %201 : vector<16x32xf32>
    %cst_56 = arith.constant dense<0.000000e+00> : vector<16xf32>
    %203 = vector.multi_reduction <add>, %202, %cst_56 [1] : vector<16x32xf32> to vector<16xf32>
    %204 = vector.shape_cast %203 : vector<16xf32> to vector<16x1xf32>
    %cst_57 = arith.constant 3.200000e+01 : f32
    %205 = vector.broadcast %cst_57 : f32 to vector<16x1xf32>
    %206 = arith.divf %204, %205 : vector<16x1xf32>
    %207 = vector.broadcast %199 : vector<16x1xf32> to vector<16x32xf32>
    %208 = arith.subf %195, %207 : vector<16x32xf32>
    %cst_58 = arith.constant 9.99999974E-6 : f32
    %209 = vector.broadcast %cst_58 : f32 to vector<16x1xf32>
    %210 = arith.addf %206, %209 : vector<16x1xf32>
    %211 = math.rsqrt %210 : vector<16x1xf32>
    %212 = vector.broadcast %211 : vector<16x1xf32> to vector<16x32xf32>
    %213 = arith.mulf %208, %212 : vector<16x32xf32>
    %214 = vector.broadcast %193 : vector<1x32xf32> to vector<16x32xf32>
    %215 = arith.mulf %213, %214 : vector<16x32xf32>
    %216 = vector.broadcast %194 : vector<1x32xf32> to vector<16x32xf32>
    %217 = arith.addf %215, %216 : vector<16x32xf32>
    %c0_59 = arith.constant 0 : index
    %c0_60 = arith.constant 0 : index
    %218 = vector.load %arg7[%c0_59, %c0_60] : memref<32x64xbf16, #tpu.memory_space<vmem>>, vector<32x64xbf16>
    %c0_61 = arith.constant 0 : index
    %c0_62 = arith.constant 0 : index
    %219 = vector.load %arg8[%c0_61, %c0_62] : memref<1x64xf32, #tpu.memory_space<vmem>>, vector<1x64xf32>
    %c0_63 = arith.constant 0 : index
    %c0_64 = arith.constant 0 : index
    %220 = vector.load %arg9[%c0_63, %c0_64] : memref<64x32xbf16, #tpu.memory_space<vmem>>, vector<64x32xbf16>
    %c0_65 = arith.constant 0 : index
    %c0_66 = arith.constant 0 : index
    %221 = vector.load %arg10[%c0_65, %c0_66] : memref<1x32xf32, #tpu.memory_space<vmem>>, vector<1x32xf32>
    %222 = arith.truncf %217 : vector<16x32xf32> to vector<16x32xbf16>
    %cst_67 = arith.constant dense<0.000000e+00> : vector<16x64xf32>
    %223 = tpu.matmul %222, %218, %cst_67 {dimension_numbers = #tpu.dot_dimension_numbers<[1], [0], [0], [1], [0, 0, 1, 1], [], []>} : vector<16x32xbf16>, vector<32x64xbf16>, vector<16x64xf32> -> vector<16x64xf32>
    %224 = vector.broadcast %219 : vector<1x64xf32> to vector<16x64xf32>
    %225 = arith.addf %223, %224 : vector<16x64xf32>
    %cst_68 = arith.constant 0.000000e+00 : f32
    %226 = vector.broadcast %cst_68 : f32 to vector<16x64xf32>
    %227 = arith.maximumf %225, %226 : vector<16x64xf32>
    %228 = arith.truncf %227 : vector<16x64xf32> to vector<16x64xbf16>
    %cst_69 = arith.constant dense<0.000000e+00> : vector<16x32xf32>
    %229 = tpu.matmul %228, %220, %cst_69 {dimension_numbers = #tpu.dot_dimension_numbers<[1], [0], [0], [1], [0, 0, 1, 1], [], []>} : vector<16x64xbf16>, vector<64x32xbf16>, vector<16x32xf32> -> vector<16x32xf32>
    %230 = vector.broadcast %221 : vector<1x32xf32> to vector<16x32xf32>
    %231 = arith.addf %229, %230 : vector<16x32xf32>
    %c0_70 = arith.constant 0 : index
    %c0_71 = arith.constant 0 : index
    %232 = vector.load %arg11[%c0_70, %c0_71] : memref<1x32xf32, #tpu.memory_space<vmem>>, vector<1x32xf32>
    %c0_72 = arith.constant 0 : index
    %c0_73 = arith.constant 0 : index
    %233 = vector.load %arg12[%c0_72, %c0_73] : memref<1x32xf32, #tpu.memory_space<vmem>>, vector<1x32xf32>
    %234 = arith.addf %217, %231 : vector<16x32xf32>
    %cst_74 = arith.constant dense<0.000000e+00> : vector<16xf32>
    %235 = vector.multi_reduction <add>, %234, %cst_74 [1] : vector<16x32xf32> to vector<16xf32>
    %236 = vector.shape_cast %235 : vector<16xf32> to vector<16x1xf32>
    %cst_75 = arith.constant 3.200000e+01 : f32
    %237 = vector.broadcast %cst_75 : f32 to vector<16x1xf32>
    %238 = arith.divf %236, %237 : vector<16x1xf32>
    %239 = vector.broadcast %238 : vector<16x1xf32> to vector<16x32xf32>
    %240 = arith.subf %234, %239 : vector<16x32xf32>
    %241 = arith.mulf %240, %240 : vector<16x32xf32>
    %cst_76 = arith.constant dense<0.000000e+00> : vector<16xf32>
    %242 = vector.multi_reduction <add>, %241, %cst_76 [1] : vector<16x32xf32> to vector<16xf32>
    %243 = vector.shape_cast %242 : vector<16xf32> to vector<16x1xf32>
    %cst_77 = arith.constant 3.200000e+01 : f32
    %244 = vector.broadcast %cst_77 : f32 to vector<16x1xf32>
    %245 = arith.divf %243, %244 : vector<16x1xf32>
    %246 = vector.broadcast %238 : vector<16x1xf32> to vector<16x32xf32>
    %247 = arith.subf %234, %246 : vector<16x32xf32>
    %cst_78 = arith.constant 9.99999974E-6 : f32
    %248 = vector.broadcast %cst_78 : f32 to vector<16x1xf32>
    %249 = arith.addf %245, %248 : vector<16x1xf32>
    %250 = math.rsqrt %249 : vector<16x1xf32>
    %251 = vector.broadcast %250 : vector<16x1xf32> to vector<16x32xf32>
    %252 = arith.mulf %247, %251 : vector<16x32xf32>
    %253 = vector.broadcast %232 : vector<1x32xf32> to vector<16x32xf32>
    %254 = arith.mulf %252, %253 : vector<16x32xf32>
    %255 = vector.broadcast %233 : vector<1x32xf32> to vector<16x32xf32>
    %256 = arith.addf %254, %255 : vector<16x32xf32>
    %c0_79 = arith.constant 0 : index
    %c0_80 = arith.constant 0 : index
    %257 = vector.load %arg13[%c0_79, %c0_80] : memref<16x32xf32, #tpu.memory_space<vmem>>, vector<16x32xf32>
    tpu.vector_store %arg13[%c0_79, %c0_80], %256 {strides = array<i32>} : memref<16x32xf32, #tpu.memory_space<vmem>>, vector<16x32xf32>,
    return
  }
}

</mosaic_0001>

<bundles_post_ra>
// kernel: tpu_custom_call.1
= control target key start
LH: loop header
LB: loop body
LE: loop exit
PB: predicated region body
PF: predicated region fallthrough
CT: control target
= control target key end

     0   :  { %18 = vsyncpa [#allocation3], 0  ;;  %s2126_s0 = inlined_call_operand.vmem [shape: f32[16,32], index: 0, kind: input, shape index: {}]   ;;  %s2127_s1 = inlined_call_operand.vmem [shape: bf16[32,96], index: 1, kind: input, shape index: {}]   ;;  %s2128_s2 = inlined_call_operand.vmem [shape: f32[1,96], index: 2, kind: input, shape index: {}]   ;;  %s2129_s3 = inlined_call_operand.vmem [shape: bf16[32,32], index: 3, kind: input, shape index: {}]   ;;  %s2130_s4 = inlined_call_operand.vmem [shape: f32[1,32], index: 4, kind: input, shape index: {}]   ;;  %s2131_s5 = inlined_call_operand.vmem [shape: f32[1,32], index: 5, kind: input, shape index: {}]   ;;  %s2132_s6 = inlined_call_operand.vmem [shape: f32[1,32], index: 6, kind: input, shape index: {}]   ;;  %s2133_s7 = inlined_call_operand.hbm [shape: bf16[32,64], index: 7, kind: input, shape index: {}]   ;;  %s2134_s8 = inlined_call_operand.vmem [shape: f32[1,64], index: 8, kind: input, shape index: {}]   ;;  %s2135_s9 = inlined_call_operand.vmem [shape: bf16[64,32], index: 9, kind: input, shape index: {}]   ;;  %s2136_s10 = inlined_call_operand.vmem [shape: f32[1,32], index: 10, kind: input, shape index: {}]   ;;  %s2137_s11 = inlined_call_operand.vmem [shape: f32[1,32], index: 11, kind: input, shape index: {}]   ;;  %s2138_s12 = inlined_call_operand.vmem [shape: f32[1,32], index: 12, kind: input, shape index: {}]   ;;  %s2139_s13 = inlined_call_operand.hbm [shape: f32[16,32], index: 13, kind: output, shape index: {}]  }
   0x1   :  { %19 = vsyncpa [#allocation4], 0  ;;  %s1737_s25 = smov [#allocation2]   ;;  %s1689_s29 = scalar_lea.hbm %s2133_s7, 256 }
   0x2   :  { %s39_s26 = sshll.u32 %s1737_s25, 4  ;;  %p1690_p0 = scmp.ne.s32.totalorder %s2133_s7, %s1689_s29  ;;  %s40_s26 = int_to_ptr.vmem [resolvable:$true] %s39_s26 }
   0x3   :  { %p1693_p1 = scmp.lt.u32.totalorder %s1689_s29, %s2133_s7 }
   0x5   :  { %p1695_p2 = pnand %p1693_p1, %p1690_p0 }
   0x7   :  { %1698 = shalt.err (!%p1695_p2)
}
   0x8   :  { %s1699_s17 = scalar_lea.vmem %s40_s26, 256  ;;  %p1704_p4 = scmp.lt.s32.totalorder %s40_s26, %s40_s26 }
   0x9   :  { %p1700_p3 = scmp.ne.s32.totalorder %s40_s26, %s1699_s17  ;;  %p1705_p5 = scmp.lt.s32.totalorder %s1699_s17, %s1699_s17 }
   0xb   :  { %p1706_p6 = por %p1705_p5, %p1704_p4 }
   0xd   :  { %p1707_p7 = pnand %p1706_p6, %p1700_p3 }
   0xf   :  { %1710 = shalt.err (!%p1707_p7)
}
  0x10   :  { %s1738_s18 = smov 64   ;;  %s1739_s19 = smov 4  }
  0x11   :  { %45 = dma.hbm_to_vmem [thread:$0]  %s2133_s7, 256, %s40_s26, [#allocation3], %s1738_s18, %s1738_s18, %s1739_s19  }
  0x12   :  { %1733 = dma.done.wait [#allocation3], 256  }
  0x13   :  { %1734 = vsyncadd [#allocation3], 4294967040  ;;  %v1740_v0 = vmov 0.0   ;;  %vm1741_vm0 = vmmov 0   ;;  %v1639_v1 = vld [vmem:[%s2127_s1] sm:$0xff]   ;;  %v1640_v2 = vld [vmem:[%s2127_s1 + $0x8] sm:$0xff]  }
  0x14   :  { %1472 = vmatprep.subr.bf16.mxu0 %v1740_v0  ;;  %1476 = vmatprep.mubr.msk.bf16.mxu0 %vm1741_vm0, %v1740_v0  ;;  %v1856_v3 = vld [vmem:[%s2126_s0] sm:$0xff]  ;;  %v1861_v4 = vld [vmem:[%s2126_s0 + $0x8] sm:$0xff]  ;;  %vm91_vm1 = vcmask 261120   ;;  %s1742_s0 = smov 120   ;;  %s1743_s30 = smov 96   ;;  %vm140_vm2 = vcmask 64512  }
  0x15   :  { %1480 = vmatprep.subr.bf16.mxu1 %v1740_v0  ;;  %1482 = vmatprep.mubr.msk.bf16.mxu1 %vm1741_vm0, %v1740_v0  ;;  %v72_v5 = vpack.c.bf16 %v1861_v4, %v1856_v3  ;;  %v1388_v6 = vld [vmem:[%s2128_s2] ss:$0 sm:$0xff]  ;;  %s1744_s14 = smov 80   ;;  %s1745_s15 = smov 88   ;;  %vm205_vm3 = vcmask 1043456   ;;  %vm595_vm4 = vcmask 130048  }
  0x16   :  { %1473 = vmatpush3.bf16.msra.mxu0 %v1639_v1  ;;  %s1746_s2 = smov 72   ;;  %s1747_s16 = smov 112   ;;  %vm597_vm5 = vcmask 195584   ;;  %vm1278_vm6 = vcmask 523264  }
  0x17   :  { %1474 = vmatprep.subr.bf16.mxu0 %v1740_v0  ;;  %s1748_s17 = smov 104   ;;  %s1749_s19 = smov 56  }
  0x18   :  { %s1750_s20 = smov 48   ;;  %s1751_s21 = smov 40  }
  0x19   :  { %s1752_s23 = smov 8   ;;  %s1753_s25 = smov 16  }
  0x1a   :  { %1475 = vmatpush3.bf16.msra.mxu0 %v1640_v2  ;;  %s1754_s26 = smov 24   ;;  %s1755_s22 = smov [#allocation5]  }
  0x1b   :  { %1486 = vmatprep.subr.bf16.mxu0 %v1740_v0  ;;  %s1376_s7 = sshll.u32 %s1755_s22, 4  ;;  %s1377_s7 = int_to_ptr.vmem [resolvable:$true] %s1376_s7 }
  0x1c   :  { %s1711_s24 = scalar_lea.vmem %s1377_s7, 256  ;;  %p1716_p9 = scmp.lt.s32.totalorder %s1377_s7, %s1377_s7 }
  0x1d   :  { %1477 = vmatmul.mubr.msk.bf16.vlgmr.msra.gmra.mrb[0].mxu0 %vm91_vm1, %v72_v5  ;;  %p1712_p8 = scmp.ne.s32.totalorder %s1377_s7, %s1711_s24  ;;  %p1717_p10 = scmp.lt.s32.totalorder %s1711_s24, %s1711_s24 }
  0x1e   :  { %1488 = vmatprep.mubr.msk.bf16.mxu0 %vm1741_vm0, %v1740_v0 }
  0x1f   :  { %p1718_p11 = por %p1717_p10, %p1716_p9 }
  0x21   :  { %p1719_p12 = pnand %p1718_p11, %p1712_p8 }
  0xf0   :  { %v129_v7 = vpop.f32.mrb[0].mxu0 }
  0xf1   :  { %v130_v8 = vadd.f32 %v1388_v6, %v129_v7  ;;  %v1478_v9 = vpop.f32.mrb[1].mxu0 }
  0xf2   :  { %v132_v10 = vpop.f32.mrb[2].mxu0 }
  0xf3   :  { %v1873_v11 = vpack.c.bf16 %v130_v8, %v130_v8  ;;  %v1479_v12 = vpop.f32.mrb[3].mxu0  ;;  %v133_v13 = vadd.f32 %v1388_v6, %v132_v10 }
  0xf5   :  { %249 = vrot.lane.b32.xlu1 %v1873_v11, %s1742_s0  ;;  %138 = vrot.lane.b32.xlu0 %v1873_v11, %s1743_s30  ;;  %v1881_v14 = vpack.c.bf16 %v133_v13, %v133_v13 }
  0xf9   :  { %362 = vrot.lane.b32.xlu1 %v1873_v11, %s1744_s14  ;;  %251 = vrot.lane.b32.xlu0 %v1873_v11, %s1745_s15 }
  0xfd   :  { %473 = vrot.lane.b32.xlu1 %v1873_v11, %s1746_s2  ;;  %360 = vrot.lane.b32.xlu0 %v1873_v11, %s1747_s16 }
 0x101   :  { %471 = vrot.lane.b32.xlu0 %v1873_v11, %s1748_s17  ;;  %601 = vrot.lane.b32.xlu1 %v1881_v14, %s1743_s30 }
 0x105   :  { %712 = vrot.lane.b32.xlu0 %v1881_v14, %s1745_s15  ;;  %710 = vrot.lane.b32.xlu1 %v1881_v14, %s1742_s0 }
 0x109   :  { %823 = vrot.lane.b32.xlu0 %v1881_v14, %s1744_s14  ;;  %821 = vrot.lane.b32.xlu1 %v1881_v14, %s1747_s16 }
 0x10d   :  { %934 = vrot.lane.b32.xlu0 %v1881_v14, %s1746_s2  ;;  %932 = vrot.lane.b32.xlu1 %v1881_v14, %s1748_s17 }
 0x167   :  { %v139_v15 = vpop.permute.xlu0 %138  ;;  %v250_v18 = vpop.permute.xlu1 %249 }
 0x168   :  { %v145_v16 = vsel %vm140_vm2, %v139_v15, 0 }
 0x169   :  { %1481 = vmatpush3.bf16.xpose.msra.mxu1 %v145_v16 }
 0x16a   :  { %1492 = vmatprep.subr.bf16.mxu1 %v1740_v0 }
 0x16b   :  { %v252_v17 = vpop.permute.xlu0 %251  ;;  %v363_v20 = vpop.permute.xlu1 %362 }
 0x16c   :  { %v257_v19 = vsel %vm140_vm2, %v252_v17, 0  ;;  %v368_v21 = vsel %vm140_vm2, %v363_v20, 0 }
 0x16f   :  { %v474_v22 = vpop.permute.xlu1 %473  ;;  %v361_v23 = vpop.permute.xlu0 %360 }
 0x170   :  { %1483 = vmatmul.mubr.msk.bf16.vlgmr.msra.gmra.mrb[0].mxu1 %vm140_vm2, %v1873_v11  ;;  %v479_v24 = vsel %vm140_vm2, %v474_v22, 0 }
 0x171   :  { %1493 = vmatpush3.bf16.xpose.msra.mxu1 %v257_v19  ;;  %1494 = vmatprep.mubr.msk.bf16.mxu1 %vm1741_vm0, %v1740_v0 }
 0x172   :  { %1504 = vmatprep.subr.bf16.mxu1 %v1740_v0 }
 0x173   :  { %v602_v25 = vpop.permute.xlu1 %601  ;;  %v472_v26 = vpop.permute.xlu0 %471 }
 0x174   :  { %v607_v27 = vsel %vm140_vm2, %v602_v25, 0 }
 0x177   :  { %v713_v28 = vpop.permute.xlu0 %712  ;;  %v711_v31 = vpop.permute.xlu1 %710 }
 0x178   :  { %1495 = vmatmul.mubr.msk.bf16.vlgmr.msra.gmra.mrb[4].mxu1 %vm140_vm2, %v250_v18  ;;  %v718_v29 = vsel %vm140_vm2, %v713_v28, 0 }
 0x179   :  { %1505 = vmatpush3.bf16.xpose.msra.mxu1 %v368_v21  ;;  %1506 = vmatprep.mubr.msk.bf16.mxu1 %vm1741_vm0, %v1740_v0 }
 0x17a   :  { %1516 = vmatprep.subr.bf16.mxu1 %v1740_v0 }
 0x17b   :  { %v824_v30 = vpop.permute.xlu0 %823  ;;  %v822_v34 = vpop.permute.xlu1 %821 }
 0x17c   :  { %v829_v32 = vsel %vm140_vm2, %v824_v30, 0 }
 0x17f   :  { %v935_v33 = vpop.permute.xlu0 %934  ;;  %v933_v36 = vpop.permute.xlu1 %932 }
 0x180   :  { %1507 = vmatmul.mubr.msk.bf16.vlgmr.msra.gmra.mrb[8].mxu1 %vm140_vm2, %v361_v23  ;;  %v940_v35 = vsel %vm140_vm2, %v935_v33, 0 }
 0x181   :  { %1517 = vmatpush3.bf16.xpose.msra.mxu1 %v479_v24  ;;  %1518 = vmatprep.mubr.msk.bf16.mxu1 %vm1741_vm0, %v1740_v0 }
 0x182   :  { %1528 = vmatprep.subr.bf16.mxu1 %v1740_v0 }
 0x188   :  { %1519 = vmatmul.mubr.msk.bf16.vlgmr.msra.gmra.mrb[12].mxu1 %vm140_vm2, %v472_v26 }
 0x189   :  { %1529 = vmatpush3.bf16.xpose.msra.mxu1 %v607_v27  ;;  %1530 = vmatprep.mubr.msk.bf16.mxu1 %vm1741_vm0, %v1740_v0 }
 0x18a   :  { %1540 = vmatprep.subr.bf16.mxu1 %v1740_v0 }
 0x190   :  { %1531 = vmatmul.mubr.msk.bf16.vlgmr.msra.gmra.mrb[16].mxu1 %vm140_vm2, %v1881_v14 }
 0x191   :  { %1541 = vmatpush3.bf16.xpose.msra.mxu1 %v718_v29  ;;  %1542 = vmatprep.mubr.msk.bf16.mxu1 %vm1741_vm0, %v1740_v0 }
 0x192   :  { %1552 = vmatprep.subr.bf16.mxu1 %v1740_v0 }
 0x198   :  { %1543 = vmatmul.mubr.msk.bf16.vlgmr.msra.gmra.mrb[20].mxu1 %vm140_vm2, %v711_v31 }
 0x199   :  { %1553 = vmatpush3.bf16.xpose.msra.mxu1 %v829_v32  ;;  %1554 = vmatprep.mubr.msk.bf16.mxu1 %vm1741_vm0, %v1740_v0 }
 0x19a   :  { %1564 = vmatprep.subr.bf16.mxu1 %v1740_v0 }
 0x1a0   :  { %1555 = vmatmul.mubr.msk.bf16.vlgmr.msra.gmra.mrb[24].mxu1 %vm140_vm2, %v822_v34 }
 0x1a1   :  { %1565 = vmatpush3.bf16.xpose.msra.mxu1 %v940_v35  ;;  %1566 = vmatprep.mubr.msk.bf16.mxu1 %vm1741_vm0, %v1740_v0 }
 0x1a2   :  { %1576 = vmatprep.subr.bf16.mxu1 %v1740_v0 }
 0x1a8   :  { %1567 = vmatmul.mubr.msk.bf16.vlgmr.msra.gmra.mrb[28].mxu1 %vm140_vm2, %v933_v36 }
 0x1a9   :  { %1580 = vmatprep.mubr.msk.bf16.mxu1 %vm1741_vm0, %v1740_v0 }
 0x243   :  { %v181_v37 = vpop.f32.mrb[0].mxu1 }
 0x244   :  { %v187_v38 = vmul.f32 0.35355338, %v181_v37  ;;  %v1484_v39 = vpop.f32.mrb[1].mxu1 }
 0x245   :  { %v184_v40 = vpop.f32.mrb[2].mxu1 }
 0x246   :  { %v1485_v41 = vpop.f32.mrb[3].mxu1  ;;  %v188_v42 = vsel %vm140_vm2, %v187_v38, -inf }
 0x247   :  { %189 = vmax.xlane.f32.xlu0 %v188_v42 }
 0x24b   :  { %v293_v43 = vpop.f32.mrb[4].mxu1 }
 0x24c   :  { %v299_v44 = vmul.f32 0.35355338, %v293_v43  ;;  %v1496_v45 = vpop.f32.mrb[5].mxu1 }
 0x24d   :  { %v296_v46 = vpop.f32.mrb[6].mxu1 }
 0x24e   :  { %v1497_v47 = vpop.f32.mrb[7].mxu1  ;;  %v300_v48 = vsel %vm140_vm2, %v299_v44, -inf }
 0x24f   :  { %301 = vmax.xlane.f32.xlu1 %v300_v48 }
 0x253   :  { %v404_v49 = vpop.f32.mrb[8].mxu1 }
 0x254   :  { %v410_v50 = vmul.f32 0.35355338, %v404_v49  ;;  %v1508_v51 = vpop.f32.mrb[9].mxu1 }
 0x255   :  { %v407_v52 = vpop.f32.mrb[10].mxu1 }
 0x256   :  { %v1509_v53 = vpop.f32.mrb[11].mxu1  ;;  %v411_v54 = vsel %vm140_vm2, %v410_v50, -inf }
 0x257   :  { %412 = vmax.xlane.f32.xlu0 %v411_v54 }
 0x25b   :  { %v515_v55 = vpop.f32.mrb[12].mxu1 }
 0x25c   :  { %v1936_v56 = vmul.f32 0.35355338, %v515_v55  ;;  %v1520_v57 = vpop.f32.mrb[13].mxu1 }
 0x25d   :  { %v518_v58 = vpop.f32.mrb[14].mxu1 }
 0x25e   :  { %v1521_v59 = vpop.f32.mrb[15].mxu1  ;;  %v522_v60 = vsel %vm140_vm2, %v1936_v56, -inf }
 0x25f   :  { %523 = vmax.xlane.f32.xlu0 %v522_v60 }
 0x263   :  { %v643_v61 = vpop.f32.mrb[16].mxu1 }
 0x264   :  { %v1940_v62 = vmul.f32 0.35355338, %v643_v61  ;;  %v1532_v63 = vpop.f32.mrb[17].mxu1 }
 0x265   :  { %v646_v1 = vpop.f32.mrb[18].mxu1 }
 0x266   :  { %v1533_v2 = vpop.f32.mrb[19].mxu1  ;;  %v650_v5 = vsel %vm140_vm2, %v1940_v62, -inf }
 0x267   :  { %651 = vmax.xlane.f32.xlu1 %v650_v5 }
 0x26b   :  { %v754_v6 = vpop.f32.mrb[20].mxu1 }
 0x26c   :  { %v1944_v7 = vmul.f32 0.35355338, %v754_v6  ;;  %v1544_v8 = vpop.f32.mrb[21].mxu1 }
 0x26d   :  { %v757_v9 = vpop.f32.mrb[22].mxu1 }
 0x26e   :  { %v1545_v10 = vpop.f32.mrb[23].mxu1  ;;  %v761_v12 = vsel %vm140_vm2, %v1944_v7, -inf }
 0x26f   :  { %762 = vmax.xlane.f32.xlu0 %v761_v12 }
 0x273   :  { %v865_v13 = vpop.f32.mrb[24].mxu1 }
 0x274   :  { %v871_v15 = vmul.f32 0.35355338, %v865_v13  ;;  %v1556_v16 = vpop.f32.mrb[25].mxu1 }
 0x275   :  { %v868_v17 = vpop.f32.mrb[26].mxu1 }
 0x276   :  { %v1557_v18 = vpop.f32.mrb[27].mxu1  ;;  %v872_v19 = vsel %vm140_vm2, %v871_v15, -inf }
 0x277   :  { %873 = vmax.xlane.f32.xlu1 %v872_v19 }
 0x27b   :  { %v976_v20 = vpop.f32.mrb[28].mxu1 }
 0x27c   :  { %v1568_v21 = vpop.f32.mrb[29].mxu1  ;;  %v1953_v24 = vmul.f32 0.35355338, %v976_v20 }
 0x27d   :  { %v979_v22 = vpop.f32.mrb[30].mxu1 }
 0x27e   :  { %v1569_v23 = vpop.f32.mrb[31].mxu1  ;;  %v983_v25 = vsel %vm140_vm2, %v1953_v24, -inf }
 0x285   :  { %312 = vrot.lane.b32.xlu0 %v1873_v11, %s1749_s19 }
 0x288   :  { %200 = vrot.lane.b32.xlu1 %v1873_v11, %s1738_s18 }
 0x2a4   :  { %984 = vmax.xlane.f32.xlu0 %v983_v25 }
 0x2d4   :  { %v190_v26 = vpop.xlane.xlu0 %189 }
 0x2d5   :  { %v191_v27 = vsub.f32 %v187_v38, %v190_v26 }
 0x2d7   :  { %v192_v28 = vmul.f32 1.442695, %v191_v27 }
 0x2d9   :  { %1649 = vpow2.f32 %v192_v28 }
 0x2dc   :  { %v302_v29 = vpop.xlane.xlu1 %301 }
 0x2dd   :  { %v303_v30 = vsub.f32 %v299_v44, %v302_v29 }
 0x2df   :  { %v304_v31 = vmul.f32 1.442695, %v303_v30 }
 0x2e1   :  { %1651 = vpow2.f32 %v304_v31 }
 0x2e3   :  { %v1957_v32 = vpop.eup %1649 }
 0x2e4   :  { %v413_v33 = vpop.xlane.xlu0 %412  ;;  %v194_v34 = vsel %vm140_vm2, %v1957_v32, 0.0 }
 0x2e5   :  { %v414_v35 = vsub.f32 %v410_v50, %v413_v33  ;;  %195 = vadd.xlane.f32.xlu1 %v194_v34 }
 0x2e7   :  { %v415_v36 = vmul.f32 1.442695, %v414_v35 }
 0x2e9   :  { %1653 = vpow2.f32 %v415_v36 }
 0x2eb   :  { %v1961_v37 = vpop.eup %1651 }
 0x2ec   :  { %v306_v38 = vsel %vm140_vm2, %v1961_v37, 0.0  ;;  %v524_v44 = vpop.xlane.xlu0 %523 }
 0x2ed   :  { %307 = vadd.xlane.f32.xlu0 %v306_v38  ;;  %v525_v46 = vsub.f32 %v1936_v56, %v524_v44 }
 0x2ef   :  { %v526_v47 = vmul.f32 1.442695, %v525_v46 }
 0x2f1   :  { %1655 = vpow2.f32 %v526_v47 }
 0x2f3   :  { %v1965_v39 = vpop.eup %1653 }
 0x2f4   :  { %v417_v40 = vsel %vm140_vm2, %v1965_v39, 0.0  ;;  %v652_v41 = vpop.xlane.xlu1 %651 }
 0x2f5   :  { %418 = vadd.xlane.f32.xlu1 %v417_v40  ;;  %v653_v48 = vsub.f32 %v1940_v62, %v652_v41 }
 0x2f7   :  { %v654_v51 = vmul.f32 1.442695, %v653_v48 }
 0x2f9   :  { %1657 = vpow2.f32 %v654_v51 }
 0x2fb   :  { %v1656_v54 = vpop.eup %1655 }
 0x2fc   :  { %v763_v49 = vpop.xlane.xlu0 %762  ;;  %v528_v55 = vsel %vm140_vm2, %v1656_v54, 0.0 }
 0x2fd   :  { %v764_v50 = vsub.f32 %v1944_v7, %v763_v49 }
 0x300   :  { %v313_v62 = vpop.permute.xlu0 %312 }
 0x301   :  { %v318_v13 = vsel %vm205_vm3, %v313_v62, 0 }
 0x303   :  { %423 = vrot.lane.b32.xlu0 %v1873_v11, %s1750_s20  ;;  %v1979_v57 = vpop.eup %1657 }
 0x304   :  { %v874_v42 = vpop.xlane.xlu1 %873  ;;  %v656_v58 = vsel %vm140_vm2, %v1979_v57, 0.0 }
 0x305   :  { %v875_v52 = vsub.f32 %v871_v15, %v874_v42 }
 0x306   :  { %534 = vrot.lane.b32.xlu1 %v1873_v11, %s1751_s21  ;;  %v765_v11 = vmul.f32 1.442695, %v764_v50 }
 0x307   :  { %v876_v53 = vmul.f32 1.442695, %v875_v52 }
 0x308   :  { %v201_v43 = vpop.permute.xlu1 %200  ;;  %1659 = vpow2.f32 %v765_v11 }
 0x309   :  { %v207_v45 = vsel %vm205_vm3, %v201_v43, 0  ;;  %1661 = vpow2.f32 %v876_v53 }
 0x30a   :  { %1487 = vmatpush3.bf16.msra.mxu0 %v207_v45 }
 0x30b   :  { %1498 = vmatprep.subr.bf16.mxu0 %v1740_v0 }
 0x312   :  { %v1981_v56 = vpop.eup %1659 }
 0x313   :  { %v1985_v59 = vpop.eup %1661  ;;  %v767_v60 = vsel %vm140_vm2, %v1981_v56, 0.0 }
 0x314   :  { %v878_v61 = vsel %vm140_vm2, %v1985_v59, 0.0 }
 0x322   :  { %529 = vadd.xlane.f32.xlu0 %v528_v55 }
 0x326   :  { %657 = vadd.xlane.f32.xlu0 %v656_v58 }
 0x32a   :  { %768 = vadd.xlane.f32.xlu1 %v767_v60  ;;  %879 = vadd.xlane.f32.xlu0 %v878_v61 }
 0x331   :  { %v985_v63 = vpop.xlane.xlu0 %984 }
 0x332   :  { %v986_v1 = vsub.f32 %v1953_v24, %v985_v63 }
 0x334   :  { %v987_v2 = vmul.f32 1.442695, %v986_v1 }
 0x336   :  { %1663 = vpow2.f32 %v987_v2 }
 0x33b   :  { %773 = vrot.lane.b32.xlu1 %v1881_v14, %s1749_s19 }
 0x33f   :  { %884 = vrot.lane.b32.xlu1 %v1881_v14, %s1750_s20 }
 0x340   :  { %v1996_v5 = vpop.eup %1663 }
 0x341   :  { %v989_v6 = vsel %vm140_vm2, %v1996_v5, 0.0 }
 0x342   :  { %990 = vadd.xlane.f32.xlu0 %v989_v6 }
 0x343   :  { %995 = vrot.lane.b32.xlu1 %v1881_v14, %s1751_s21 }
 0x358   :  { %662 = vrot.lane.b32.xlu0 %v1881_v14, %s1738_s18 }
 0x372   :  { %v196_v7 = vpop.xlane.xlu1 %195 }
 0x373   :  { %1665 = vrcp.f32 %v196_v7 }
 0x37a   :  { %v308_v8 = vpop.xlane.xlu0 %307 }
 0x37b   :  { %1667 = vrcp.f32 %v308_v8 }
 0x37d   :  { %v1666_v9 = vpop.eup %1665 }
 0x37e   :  { %v198_v10 = vmul.f32 %v1666_v9, %v1957_v32  ;;  %v424_v17 = vpop.permute.xlu0 %423 }
 0x37f   :  { %v429_v19 = vsel %vm205_vm3, %v424_v17, 0 }
 0x380   :  { %v199_v12 = vpack.c.bf16 %v198_v10, %v198_v10 }
 0x382   :  { %1489 = vmatmul.mubr.msk.bf16.vlgmr.msra.gmra.mrb[4].mxu0 %vm140_vm2, %v199_v12  ;;  %v419_v15 = vpop.xlane.xlu1 %418 }
 0x383   :  { %1499 = vmatpush3.bf16.msra.mxu0 %v318_v13  ;;  %1669 = vrcp.f32 %v419_v15  ;;  %1500 = vmatprep.mubr.msk.bf16.mxu0 %vm1741_vm0, %v1740_v0  ;;  %v1641_v13 = vld [vmem:[%s2129_s3] sm:$0xff]  }
 0x384   :  { %1510 = vmatprep.subr.bf16.mxu0 %v1740_v0  ;;  %1577 = vmatpush3.bf16.msra.mxu1 %v1641_v13 }
 0x385   :  { %v1668_v14 = vpop.eup %1667  ;;  %1578 = vmatprep.subr.bf16.mxu1 %v1740_v0 }
 0x386   :  { %v310_v16 = vmul.f32 %v1668_v14, %v1961_v37  ;;  %v535_v22 = vpop.permute.xlu1 %534 }
 0x387   :  { %v540_v24 = vsel %vm205_vm3, %v535_v22, 0 }
 0x388   :  { %v311_v18 = vpack.c.bf16 %v310_v16, %v310_v16 }
 0x38a   :  { %1501 = vmatmul.mubr.msk.bf16.vlgmr.msra.gmra.mrb[8].mxu0 %vm140_vm2, %v311_v18  ;;  %v1642_v18 = vld [vmem:[%s2129_s3 + $0x8] sm:$0xff]  }
 0x38b   :  { %1511 = vmatpush3.bf16.msra.mxu0 %v429_v19  ;;  %1512 = vmatprep.mubr.msk.bf16.mxu0 %vm1741_vm0, %v1740_v0 }
 0x38c   :  { %1522 = vmatprep.subr.bf16.mxu0 %v1740_v0  ;;  %1579 = vmatpush3.bf16.msra.mxu1 %v1642_v18 }
 0x38d   :  { %v1670_v20 = vpop.eup %1669  ;;  %1592 = vmatprep.subr.bf16.mxu1 %v1740_v0 }
 0x38e   :  { %v421_v21 = vmul.f32 %v1670_v20, %v1965_v39 }
 0x390   :  { %v422_v23 = vpack.c.bf16 %v421_v21, %v421_v21 }
 0x392   :  { %1513 = vmatmul.mubr.msk.bf16.vlgmr.msra.gmra.mrb[12].mxu0 %vm140_vm2, %v422_v23 }
 0x393   :  { %1523 = vmatpush3.bf16.msra.mxu0 %v540_v24  ;;  %1524 = vmatprep.mubr.msk.bf16.mxu0 %vm1741_vm0, %v1740_v0 }
 0x394   :  { %1534 = vmatprep.subr.bf16.mxu0 %v1740_v0 }
 0x3af   :  { %v530_v25 = vpop.xlane.xlu0 %529 }
 0x3b0   :  { %1671 = vrcp.f32 %v530_v25 }
 0x3b3   :  { %v658_v29 = vpop.xlane.xlu0 %657 }
 0x3b4   :  { %1673 = vrcp.f32 %v658_v29 }
 0x3b7   :  { %v769_v30 = vpop.xlane.xlu1 %768  ;;  %v880_v31 = vpop.xlane.xlu0 %879 }
 0x3b8   :  { %1675 = vrcp.f32 %v769_v30 }
 0x3b9   :  { %1677 = vrcp.f32 %v880_v31 }
 0x3ba   :  { %v1672_v26 = vpop.eup %1671 }
 0x3bb   :  { %v532_v27 = vmul.f32 %v1672_v26, %v1656_v54  ;;  %v774_v37 = vpop.permute.xlu1 %773 }
 0x3bc   :  { %v779_v40 = vsel %vm205_vm3, %v774_v37, 0 }
 0x3bd   :  { %v533_v28 = vpack.c.bf16 %v532_v27, %v532_v27 }
 0x3be   :  { %v1674_v32 = vpop.eup %1673 }
 0x3bf   :  { %1525 = vmatmul.mubr.msk.bf16.vlgmr.msra.gmra.mrb[16].mxu0 %vm140_vm2, %v533_v28  ;;  %v660_v34 = vmul.f32 %v1674_v32, %v1979_v57  ;;  %v885_v42 = vpop.permute.xlu1 %884 }
 0x3c0   :  { %1536 = vmatprep.mubr.msk.bf16.mxu0 %vm1741_vm0, %v1740_v0  ;;  %v890_v45 = vsel %vm205_vm3, %v885_v42, 0 }
 0x3c1   :  { %v661_v38 = vpack.c.bf16 %v660_v34, %v660_v34 }
 0x3c2   :  { %v1676_v39 = vpop.eup %1675 }
 0x3c3   :  { %v771_v41 = vmul.f32 %v1676_v39, %v1981_v56  ;;  %v1678_v44 = vpop.eup %1677  ;;  %v996_v47 = vpop.permute.xlu1 %995 }
 0x3c4   :  { %v882_v46 = vmul.f32 %v1678_v44, %v1985_v59  ;;  %v1001_v50 = vsel %vm205_vm3, %v996_v47, 0 }
 0x3c5   :  { %v772_v43 = vpack.c.bf16 %v771_v41, %v771_v41 }
 0x3c6   :  { %v883_v48 = vpack.c.bf16 %v882_v46, %v882_v46 }
 0x3cf   :  { %v991_v33 = vpop.xlane.xlu0 %990 }
 0x3d0   :  { %1679 = vrcp.f32 %v991_v33 }
 0x3d3   :  { %v663_v35 = vpop.permute.xlu0 %662 }
 0x3d4   :  { %v668_v36 = vsel %vm205_vm3, %v663_v35, 0 }
 0x3d5   :  { %1535 = vmatpush3.bf16.msra.mxu0 %v668_v36 }
 0x3d6   :  { %1546 = vmatprep.subr.bf16.mxu0 %v1740_v0 }
 0x3d8   :  { %1537 = vmatmul.mubr.msk.bf16.vlgmr.msra.gmra.mrb[20].mxu0 %vm140_vm2, %v661_v38 }
 0x3d9   :  { %1547 = vmatpush3.bf16.msra.mxu0 %v779_v40  ;;  %1548 = vmatprep.mubr.msk.bf16.mxu0 %vm1741_vm0, %v1740_v0 }
 0x3da   :  { %1558 = vmatprep.subr.bf16.mxu0 %v1740_v0  ;;  %v1680_v49 = vpop.eup %1679 }
 0x3db   :  { %v993_v51 = vmul.f32 %v1680_v49, %v1996_v5 }
 0x3dd   :  { %v994_v52 = vpack.c.bf16 %v993_v51, %v993_v51 }
 0x3e0   :  { %1549 = vmatmul.mubr.msk.bf16.vlgmr.msra.gmra.mrb[24].mxu0 %vm140_vm2, %v772_v43 }
 0x3e1   :  { %1559 = vmatpush3.bf16.msra.mxu0 %v890_v45  ;;  %1560 = vmatprep.mubr.msk.bf16.mxu0 %vm1741_vm0, %v1740_v0  ;;  %v1408_v45 = vld [vmem:[%s2130_s4] ss:$0 sm:$0xff] }
 0x3e2   :  { %1570 = vmatprep.subr.bf16.mxu0 %v1740_v0 }
 0x3e8   :  { %1561 = vmatmul.mubr.msk.bf16.vlgmr.msra.gmra.mrb[28].mxu0 %vm140_vm2, %v883_v48 }
 0x3e9   :  { %1571 = vmatpush3.bf16.msra.mxu0 %v1001_v50  ;;  %1572 = vmatprep.mubr.msk.bf16.mxu0 %vm1741_vm0, %v1740_v0 }
 0x3ea   :  { %1584 = vmatprep.subr.bf16.mxu0 %v1740_v0 }
 0x3f0   :  { %1573 = vmatmul.mubr.msk.bf16.vlgmr.msra.gmra.mrb[32].mxu0 %vm140_vm2, %v994_v52 }
 0x3f1   :  { %1588 = vmatprep.mubr.msk.bf16.mxu0 %vm1741_vm0, %v1740_v0 }
 0x455   :  { %v243_v11 = vpop.f32.mrb[4].mxu0 }
 0x456   :  { %v1490_v53 = vpop.f32.mrb[5].mxu0 }
 0x457   :  { %v246_v54 = vpop.f32.mrb[6].mxu0 }
 0x458   :  { %v1491_v55 = vpop.f32.mrb[7].mxu0 }
 0x45d   :  { %v354_v57 = vpop.f32.mrb[8].mxu0 }
 0x45e   :  { %v1502_v56 = vpop.f32.mrb[9].mxu0 }
 0x45f   :  { %v357_v58 = vpop.f32.mrb[10].mxu0 }
 0x460   :  { %v1503_v59 = vpop.f32.mrb[11].mxu0 }
 0x465   :  { %v465_v60 = vpop.f32.mrb[12].mxu0 }
 0x466   :  { %v1514_v61 = vpop.f32.mrb[13].mxu0 }
 0x467   :  { %v468_v62 = vpop.f32.mrb[14].mxu0 }
 0x468   :  { %v1515_v63 = vpop.f32.mrb[15].mxu0 }
 0x492   :  { %v576_v1 = vpop.f32.mrb[16].mxu0 }
 0x493   :  { %v1526_v2 = vpop.f32.mrb[17].mxu0 }
 0x494   :  { %v579_v5 = vpop.f32.mrb[18].mxu0  ;;  %v1645_v2 = vld [vmem:[%s2135_s9] sm:$0xff]  }
 0x495   :  { %v1527_v6 = vpop.f32.mrb[19].mxu0  ;;  %v1646_v5 = vld [vmem:[%s2135_s9 + $0x8] sm:$0xff]  }
 0x4ab   :  { %v704_v7 = vpop.f32.mrb[20].mxu0 }
 0x4ac   :  { %v1538_v8 = vpop.f32.mrb[21].mxu0 }
 0x4ad   :  { %v707_v9 = vpop.f32.mrb[22].mxu0 }
 0x4ae   :  { %v1539_v10 = vpop.f32.mrb[23].mxu0 }
 0x4b3   :  { %v815_v12 = vpop.f32.mrb[24].mxu0 }
 0x4b4   :  { %v1624_v15 = vpack.i.bf16 %v815_v12, %v354_v57  ;;  %v1550_v14 = vpop.f32.mrb[25].mxu0 }
 0x4b5   :  { %v818_v16 = vpop.f32.mrb[26].mxu0 }
 0x4b6   :  { %1625 = vrot.lane.b32.xlu1 %v1624_v15, %s1752_s23  ;;  %v1551_v17 = vpop.f32.mrb[27].mxu0  ;;  %v1412_v15 = vld [vmem:[%s2131_s5] ss:$0 sm:$0xff] }
 0x4bb   :  { %v926_v19 = vpop.f32.mrb[28].mxu0 }
 0x4bc   :  { %v1629_v20 = vpack.i.bf16 %v926_v19, %v465_v60  ;;  %v1562_v21 = vpop.f32.mrb[29].mxu0  ;;  %v1413_v19 = vld [vmem:[%s2132_s6] ss:$0 sm:$0xff] }
 0x4bd   :  { %v929_v22 = vpop.f32.mrb[30].mxu0 }
 0x4be   :  { %1630 = vrot.lane.b32.xlu1 %v1629_v20, %s1753_s25  ;;  %v1563_v23 = vpop.f32.mrb[31].mxu0 }
 0x4c3   :  { %v1037_v24 = vpop.f32.mrb[32].mxu0 }
 0x4c4   :  { %v1634_v25 = vpack.i.bf16 %v1037_v24, %v576_v1  ;;  %v1574_v26 = vpop.f32.mrb[33].mxu0  ;;  %v1643_v1 = vld [vmem:[#allocation2] sm:$0xff]   ;;  %v1647_v24 = vld [vmem:[%s2135_s9 + $0x10] sm:$0xff]  }
 0x4c5   :  { %v1040_v27 = vpop.f32.mrb[34].mxu0  ;;  %1585 = vmatpush3.bf16.msra.mxu0 %v1643_v1  ;;  %v1414_v26 = vld [vmem:[%s2134_s8] ss:$0 sm:$0xff] }
 0x4c6   :  { %1635 = vrot.lane.b32.xlu0 %v1634_v25, %s1754_s26  ;;  %v1575_v28 = vpop.f32.mrb[35].mxu0  ;;  %1586 = vmatprep.subr.bf16.mxu0 %v1740_v0  ;;  %v1648_v25 = vld [vmem:[%s2135_s9 + $0x18] sm:$0xff]   ;;  %v1425_v1 = vld [vmem:[%s2138_s12] ss:$0 sm:$0xff] }
 0x528   :  { %v1626_v29 = vpop.permute.xlu1 %1625 }
 0x529   :  { %v1628_v31 = vunpack.i.h.bf16 %v1626_v29  ;;  %v1627_v32 = vunpack.i.l.bf16 %v1626_v29 }
 0x52b   :  { %v1055_v36 = vsel %vm140_vm2, %v704_v7, %v1628_v31  ;;  %v594_v37 = vsel %vm140_vm2, %v243_v11, %v1627_v32 }
 0x530   :  { %v1631_v30 = vpop.permute.xlu1 %1630 }
 0x531   :  { %v1633_v33 = vunpack.i.h.bf16 %v1631_v30  ;;  %v1632_v34 = vunpack.i.l.bf16 %v1631_v30 }
 0x533   :  { %v1056_v40 = vsel %vm595_vm4, %v1055_v36, %v1633_v33  ;;  %v596_v41 = vsel %vm595_vm4, %v594_v37, %v1632_v34 }
 0x538   :  { %v1636_v35 = vpop.permute.xlu0 %1635 }
 0x539   :  { %v1638_v38 = vunpack.i.h.bf16 %v1636_v35  ;;  %v1637_v39 = vunpack.i.l.bf16 %v1636_v35 }
 0x53b   :  { %v1057_v42 = vsel %vm597_vm5, %v1056_v40, %v1638_v38  ;;  %v598_v43 = vsel %vm597_vm5, %v596_v41, %v1637_v39 }
 0x53c   :  { %v1058_v44 = vpack.c.bf16 %v1057_v42, %v598_v43 }
 0x53e   :  { %1581 = vmatmul.mubr.msk.bf16.vlgmr.msra.gmra.mrb[32].mxu1 %vm91_vm1, %v1058_v44 }
 0x53f   :  { %1600 = vmatprep.mubr.msk.bf16.mxu1 %vm1741_vm0, %v1740_v0  ;;  %1593 = vmatpush3.bf16.msra.mxu1 %v1645_v2 }
 0x540   :  { %1594 = vmatprep.subr.bf16.mxu1 %v1740_v0 }
 0x543   :  { %1595 = vmatpush3.bf16.msra.mxu1 %v1646_v5 }
 0x544   :  { %1596 = vmatprep.subr.bf16.mxu1 %v1740_v0 }
 0x547   :  { %1597 = vmatpush3.bf16.msra.mxu1 %v1647_v24 }
 0x548   :  { %1598 = vmatprep.subr.bf16.mxu1 %v1740_v0  ;;  %v1418_v0 = vld [vmem:[%s2136_s10] ss:$0 sm:$0xff] }
 0x54b   :  { %1599 = vmatpush3.bf16.msra.mxu1 %v1648_v25 }
 0x611   :  { %v1114_v46 = vpop.f32.mrb[32].mxu1 }
 0x612   :  { %v1115_v47 = vadd.f32 %v1408_v45, %v1114_v46  ;;  %v1582_v48 = vpop.f32.mrb[33].mxu1 }
 0x613   :  { %v1117_v49 = vpop.f32.mrb[34].mxu1 }
 0x614   :  { %v1118_v50 = vadd.f32 %v1408_v45, %v1117_v49  ;;  %v1583_v51 = vpop.f32.mrb[35].mxu1  ;;  %v1123_v52 = vadd.f32 %v1115_v47, %v1856_v3 }
 0x616   :  { %v1125_v11 = vsel %vm91_vm1, %v1123_v52, 0.0  ;;  %v1124_v53 = vadd.f32 %v1118_v50, %v1861_v4  ;;  %v1644_v4 = vld [vmem:[#allocation2 + $0x8] sm:$0xff]  }
 0x617   :  { %1126 = vadd.xlane.f32.xlu1 %v1125_v11  ;;  %1587 = vmatpush3.bf16.msra.mxu0 %v1644_v4 }
 0x618   :  { %v1128_v54 = vsel %vm91_vm1, %v1124_v53, 0.0 }
 0x619   :  { %1129 = vadd.xlane.f32.xlu0 %v1128_v54 }
 0x6a4   :  { %v1127_v55 = vpop.xlane.xlu1 %1126 }
 0x6a5   :  { %v1132_v57 = vmul.f32 0.03125, %v1127_v55 }
 0x6a6   :  { %v1130_v56 = vpop.xlane.xlu0 %1129 }
 0x6a7   :  { %v1134_v58 = vsub.f32 %v1123_v52, %v1132_v57  ;;  %v1133_v59 = vmul.f32 0.03125, %v1130_v56 }
 0x6a9   :  { %v1135_v60 = vsub.f32 %v1124_v53, %v1133_v59  ;;  %v1136_v61 = vmul.f32 %v1134_v58, %v1134_v58 }
 0x6ab   :  { %v1138_v62 = vsel %vm91_vm1, %v1136_v61, 0.0  ;;  %v1137_v63 = vmul.f32 %v1135_v60, %v1135_v60 }
 0x6ac   :  { %1139 = vadd.xlane.f32.xlu0 %v1138_v62  ;;  %v1424_v62 = vld [vmem:[%s2137_s11] ss:$0 sm:$0xff] }
 0x6ad   :  { %v1141_v3 = vsel %vm91_vm1, %v1137_v63, 0.0 }
 0x6ae   :  { %1142 = vadd.xlane.f32.xlu1 %v1141_v3 }
 0x739   :  { %v1140_v6 = vpop.xlane.xlu0 %1139 }
 0x73a   :  { %v1144_v7 = vmul.f32 0.03125, %v1140_v6 }
 0x73b   :  { %v1143_v8 = vpop.xlane.xlu1 %1142 }
 0x73c   :  { %v1146_v9 = vadd.f32 1e-05, %v1144_v7  ;;  %v1145_v10 = vmul.f32 0.03125, %v1143_v8 }
 0x73e   :  { %1681 = vrsqrt.f32 %v1146_v9  ;;  %v1147_v12 = vadd.f32 1e-05, %v1145_v10 }
 0x740   :  { %1683 = vrsqrt.f32 %v1147_v12 }
 0x748   :  { %v1682_v13 = vpop.eup %1681 }
 0x749   :  { %v1150_v14 = vmul.f32 %v1682_v13, %v1134_v58 }
 0x74a   :  { %v1684_v16 = vpop.eup %1683 }
 0x74b   :  { %v1158_v17 = vmul.f32 %v1412_v15, %v1150_v14  ;;  %v1151_v18 = vmul.f32 %v1684_v16, %v1135_v60 }
 0x74d   :  { %v1159_v20 = vmul.f32 %v1412_v15, %v1151_v18  ;;  %v1166_v21 = vadd.f32 %v1413_v19, %v1158_v17 }
 0x74f   :  { %v1167_v22 = vadd.f32 %v1413_v19, %v1159_v20 }
 0x751   :  { %v1182_v23 = vpack.c.bf16 %v1167_v22, %v1166_v21 }
 0x753   :  { %1589 = vmatmul.mubr.msk.bf16.vlgmr.msra.gmra.mrb[36].mxu0 %vm91_vm1, %v1182_v23 }
 0x826   :  { %v1238_v27 = vpop.f32.mrb[36].mxu0 }
 0x827   :  { %v1239_v28 = vadd.f32 %v1414_v26, %v1238_v27  ;;  %v1590_v29 = vpop.f32.mrb[37].mxu0 }
 0x828   :  { %v1241_v30 = vpop.f32.mrb[38].mxu0 }
 0x829   :  { %v1242_v31 = vadd.f32 %v1414_v26, %v1241_v30  ;;  %v1591_v32 = vpop.f32.mrb[39].mxu0  ;;  %v1245_v33 = vmax.f32 %v1239_v28, 0.0 }
 0x82b   :  { %v1246_v34 = vmax.f32 %v1242_v31, 0.0 }
 0x82d   :  { %v1247_v35 = vpack.c.bf16 %v1246_v34, %v1245_v33 }
 0x82f   :  { %1601 = vmatmul.mubr.msk.bf16.vlgmr.msra.gmra.mrb[36].mxu1 %vm1278_vm6, %v1247_v35 }
 0x902   :  { %v1316_v36 = vpop.f32.mrb[36].mxu1 }
 0x903   :  { %v1317_v37 = vadd.f32 %v1418_v0, %v1316_v36  ;;  %v1602_v38 = vpop.f32.mrb[37].mxu1 }
 0x904   :  { %v1319_v39 = vpop.f32.mrb[38].mxu1 }
 0x905   :  { %v1320_v40 = vadd.f32 %v1418_v0, %v1319_v39  ;;  %v1603_v41 = vpop.f32.mrb[39].mxu1  ;;  %v1325_v42 = vadd.f32 %v1317_v37, %v1166_v21 }
 0x907   :  { %v1327_v43 = vsel %vm91_vm1, %v1325_v42, 0.0  ;;  %v1326_v44 = vadd.f32 %v1320_v40, %v1167_v22 }
 0x908   :  { %1328 = vadd.xlane.f32.xlu0 %v1327_v43 }
 0x909   :  { %v1330_v45 = vsel %vm91_vm1, %v1326_v44, 0.0 }
 0x90a   :  { %1331 = vadd.xlane.f32.xlu1 %v1330_v45 }
 0x995   :  { %v1329_v46 = vpop.xlane.xlu0 %1328 }
 0x996   :  { %v1333_v47 = vmul.f32 0.03125, %v1329_v46 }
 0x997   :  { %v1332_v48 = vpop.xlane.xlu1 %1331 }
 0x998   :  { %v1335_v49 = vsub.f32 %v1325_v42, %v1333_v47  ;;  %v1334_v50 = vmul.f32 0.03125, %v1332_v48 }
 0x99a   :  { %v1336_v51 = vsub.f32 %v1326_v44, %v1334_v50  ;;  %v1337_v52 = vmul.f32 %v1335_v49, %v1335_v49 }
 0x99c   :  { %v1339_v11 = vsel %vm91_vm1, %v1337_v52, 0.0  ;;  %v1338_v53 = vmul.f32 %v1336_v51, %v1336_v51 }
 0x99d   :  { %1340 = vadd.xlane.f32.xlu0 %v1339_v11 }
 0x99e   :  { %v1342_v54 = vsel %vm91_vm1, %v1338_v53, 0.0 }
 0x99f   :  { %1343 = vadd.xlane.f32.xlu1 %v1342_v54 }
 0xa2a   :  { %v1341_v55 = vpop.xlane.xlu0 %1340 }
 0xa2b   :  { %v1345_v57 = vmul.f32 0.03125, %v1341_v55 }
 0xa2c   :  { %v1344_v56 = vpop.xlane.xlu1 %1343 }
 0xa2d   :  { %v1347_v58 = vadd.f32 1e-05, %v1345_v57  ;;  %v1346_v59 = vmul.f32 0.03125, %v1344_v56 }
 0xa2f   :  { %1685 = vrsqrt.f32 %v1347_v58  ;;  %v1348_v60 = vadd.f32 1e-05, %v1346_v59 }
 0xa31   :  { %1687 = vrsqrt.f32 %v1348_v60 }
 0xa39   :  { %v1686_v61 = vpop.eup %1685 }
 0xa3a   :  { %v1351_v63 = vmul.f32 %v1686_v61, %v1335_v49 }
 0xa3b   :  { %v1688_v3 = vpop.eup %1687 }
 0xa3c   :  { %v1359_v4 = vmul.f32 %v1424_v62, %v1351_v63  ;;  %v1352_v2 = vmul.f32 %v1688_v3, %v1336_v51 }
 0xa3e   :  { %v1360_v5 = vmul.f32 %v1424_v62, %v1352_v2  ;;  %v1367_v6 = vadd.f32 %v1425_v1, %v1359_v4 }
 0xa40   :  { %v1368_v7 = vadd.f32 %v1425_v1, %v1360_v5  ;;  %1369 = vst.msk [vmem:[#allocation5] sm:$0xff] %vm91_vm1, %v1367_v6 }
 0xa42   :  { %1370 = vst.msk [vmem:[#allocation5 + $0x8] sm:$0xff] %vm91_vm1, %v1368_v7 }
 0xa43   :  { %1722 = shalt.err (!%p1719_p12)
}
 0xa44   :  { %s1723_s25 = scalar_lea.hbm %s2139_s13, 256 }
 0xa45   :  { %p1724_p13 = scmp.ne.s32.totalorder %s2139_s13, %s1723_s25  ;;  %p1727_p0 = scmp.lt.u32.totalorder %s1723_s25, %s2139_s13 }
 0xa47   :  { %p1729_p1 = pnand %p1727_p0, %p1724_p13 }
 0xa49   :  { %1732 = shalt.err (!%p1729_p1)
}
 0xa4a   :  { %s1756_s28 = smov 128  }
 0xa4b   :  { %1382 = dma.vmem_to_hbm [thread:$0]  %s1377_s7, 256, %s2139_s13, [#allocation4], %s1756_s28, %s1756_s28, %s1752_s23  }
 0xa4c   :  { %1735 = dma.done.wait [#allocation4], 256  }
 0xa4d   :  { %1736 = vsyncadd [#allocation4], 4294967040 }
 0xa4e   :  { %1386 = vsyncpa [#allocation3], 1 }
 0xa4f   :  { %1387 = vsyncpa [#allocation4], 1 }

</bundles_post_ra>
